<compile_context>
chip_gen: v7x
topology: tpu7x:2x2x1
jax: 0.10.0
libtpu: 0.0.40
codegen_flags: <defaults>
</compile_context>

<pallas_src>
import functools

import numpy as np
import jax
import jax.numpy as jnp
from jax.experimental import pallas as pl
from jax.experimental.pallas import tpu as pltpu


def _round_up(x, m):
    return (x + m - 1) // m * m


# ---------------------------------------------------------------------------
# Fused decoder-block kernel (one batch element per grid step)
# ---------------------------------------------------------------------------
def _block_kernel(*refs, H, W, mid, kout, has_skip, has_final):
    """Ref order: x, [skip], w1, b1, wd, bt, w2p, b2p, [wfp], out, ybuf, im.

    x    : (1, H*W, Cin)          bf16  spatially-flattened NHWC input
    skip : (1, H, 2, W, 2*Cout)   bf16  free reshape of NHWC (2H, 2W, Cout)
    wd   : (9*mid, 4*mid)         bf16  K-packed deconv weights (dx-major shifts x phases)
    w2p  : (2*mid, 2*Cout)        bf16  pair-packed (column-parity) conv1x1 #2
    out  : (1, H, 2, W, 2*kout)         free reshape of NHWC (2H, 2W, kout)
    ybuf : (total, mid)           bf16  zero-margined flat mid-channel buffer (scratch)
    im   : (H*W, 9*mid)           bf16  im2col slab for the K-fused deconv (scratch)
    """
    it = iter(refs)
    x_ref = next(it)
    skip_ref = next(it) if has_skip else None
    w1_ref = next(it)
    b1_ref = next(it)
    wd_ref = next(it)
    bt_ref = next(it)
    w2_ref = next(it)
    b2_ref = next(it)
    wf_ref = next(it) if has_final else None
    o_ref = next(it)
    ybuf_ref = next(it)
    im_ref = next(it)

    HW = H * W
    base = _round_up(W + 1, 8)            # 8-aligned leading zero margin
    total = ybuf_ref.shape[0]
    tail = total - base - HW

    # --- conv1x1 #1 + BN + ReLU (bf16 in, f32 accumulation) -------------------
    y = jnp.dot(x_ref[0], w1_ref[...], preferred_element_type=jnp.float32)
    y = jnp.maximum(y + b1_ref[...], 0.0)                           # (HW, mid) f32

    # --- zero only the margins; write the interior once as bf16 ---------------
    ybuf_ref[pl.ds(0, base), :] = jnp.zeros((base, mid), jnp.bfloat16)
    ybuf_ref[pl.ds(base + HW, tail), :] = jnp.zeros((tail, mid), jnp.bfloat16)
    ybuf_ref[pl.ds(base, HW), :] = y.astype(jnp.bfloat16)

    # --- edge masks from iota (kill column wrap of the flat dx=+-1 reads) -----
    col = jax.lax.broadcasted_iota(jnp.int32, (HW, 1), 0) % W
    mask_l = (col > 0).astype(jnp.bfloat16)
    mask_r = (col < W - 1).astype(jnp.bfloat16)

    # --- im2col: 9 shifted bf16 views packed along K (dx-major) ---------------
    for gi, dx in enumerate((-1, 0, 1)):
        for gj, dy in enumerate((-1, 0, 1)):
            s = ybuf_ref[pl.ds(base + dy * W + dx, HW), :]
            if dx < 0:
                s = s * mask_l
            elif dx > 0:
                s = s * mask_r
            im_ref[:, pl.ds((gi * 3 + gj) * mid, mid)] = s

    # --- ConvTranspose2d(4,2,1) + BN + ReLU: ONE K-fused MXU matmul -----------
    acc = jnp.dot(im_ref[...], wd_ref[...], preferred_element_type=jnp.float32)
    up = jnp.maximum(acc + bt_ref[...], 0.0).astype(jnp.bfloat16)   # (HW, 4*mid)

    # --- conv1x1 #2 + BN + ReLU (+ fused final conv), per output-row parity ---
    two_k = 2 * kout
    for r in (0, 1):
        z = jnp.dot(up[:, 2 * r * mid:(2 * r + 2) * mid], w2_ref[...],
                    preferred_element_type=jnp.float32)
        z = jnp.maximum(z + b2_ref[...], 0.0)                       # (HW, 2*Cout)
        if has_final:                                               # Dropout(p=0) == identity
            z = jnp.dot(z.astype(jnp.bfloat16), wf_ref[...],
                        preferred_element_type=jnp.float32)         # (HW, 2*kout)
        zr = z.reshape(H, W, two_k)
        if has_skip:
            zr = zr + skip_ref[0, :, r].astype(jnp.float32)
        o_ref[0, :, r] = zr.astype(o_ref.dtype)                     # one bulk store per parity


def fused_block(x_nhwc, skip_nhwc, bp, final_wp=None):
    """One LinknetDecoderBlock (optionally + fused final 1x1 conv). NHWC in / NHWC out."""
    N, H, W, Cin = x_nhwc.shape
    mid = bp["w1"].shape[1]
    cout = bp["b2p"].shape[1] // 2
    has_skip = skip_nhwc is not None
    has_final = final_wp is not None
    kout = (final_wp.shape[1] // 2) if has_final else cout
    out_dtype = jnp.float32 if has_final else jnp.bfloat16
    HW = H * W
    base = _round_up(W + 1, 8)
    total = _round_up(base + HW + W + 1, 8)

    x_flat = x_nhwc.reshape(N, HW, Cin)                             # free reshape

    def rep2(arr):
        return pl.BlockSpec(arr.shape, lambda n: (0, 0))

    inputs = [x_flat]
    in_specs = [pl.BlockSpec((1, HW, Cin), lambda n: (n, 0, 0))]
    if has_skip:
        skip_r = skip_nhwc.reshape(N, H, 2, W, 2 * cout)            # free reshape
        inputs.append(skip_r)
        in_specs.append(pl.BlockSpec((1, H, 2, W, 2 * cout),
                                     lambda n: (n, 0, 0, 0, 0)))
    for name in ("w1", "b1", "wd", "bt", "w2p", "b2p"):
        inputs.append(bp[name])
        in_specs.append(rep2(bp[name]))
    if has_final:
        inputs.append(final_wp)
        in_specs.append(rep2(final_wp))

    flops = 2 * N * HW * (Cin * mid + (9 * mid) * (4 * mid)
                          + 2 * (2 * mid) * (2 * cout))
    if has_final:
        flops += 2 * N * HW * 2 * (2 * cout) * (2 * kout)
    bytes_in = sum(int(np.prod(a.shape)) * a.dtype.itemsize for a in inputs)
    bytes_out = N * HW * 4 * kout * (4 if has_final else 2)

    kernel = functools.partial(_block_kernel, H=H, W=W, mid=mid, kout=kout,
                               has_skip=has_skip, has_final=has_final)
    out = pl.pallas_call(
        kernel,
        out_shape=jax.ShapeDtypeStruct((N, H, 2, W, 2 * kout), out_dtype),
        grid=(N,),
        in_specs=in_specs,
        out_specs=pl.BlockSpec((1, H, 2, W, 2 * kout), lambda n: (n, 0, 0, 0, 0)),
        scratch_shapes=[pltpu.VMEM((total, mid), jnp.bfloat16),
                        pltpu.VMEM((HW, 9 * mid), jnp.bfloat16)],
        compiler_params=pltpu.CompilerParams(
            dimension_semantics=("parallel",),
            vmem_limit_bytes=48 * 1024 * 1024),
        cost_estimate=pl.CostEstimate(flops=int(flops), transcendentals=0,
                                      bytes_accessed=int(bytes_in + bytes_out)),
    )(*inputs)
    return out.reshape(N, 2 * H, 2 * W, kout)                       # free regrouping reshape


# ---------------------------------------------------------------------------
# Parameters: raw (for the reference) and packed (BN folded, phase/K packed, bf16)
# ---------------------------------------------------------------------------
def _bn_fold(gamma, beta, mean, var, bias=None, eps=1e-5):
    scale = gamma / jnp.sqrt(var + eps)
    b = bias if bias is not None else 0.0
    shift = beta + (b - mean) * scale
    return scale, shift


def _bn_raw(key, c):
    k1, k2, k3, k4 = jax.random.split(key, 4)
    gamma = 1.0 + 0.1 * jax.random.normal(k1, (c,))
    beta = 0.1 * jax.random.normal(k2, (c,))
    mean = 0.1 * jax.random.normal(k3, (c,))
    var = 1.0 + 0.1 * jax.random.uniform(k4, (c,))
    return gamma, beta, mean, var


def init_block_raw(key, in_ch, out_ch):
    mid = in_ch // 4
    keys = jax.random.split(key, 7)
    return dict(
        w1=0.1 * jax.random.normal(keys[0], (in_ch, mid)),          # conv1x1 (bias=False)
        bn1=_bn_raw(keys[1], mid),
        wt=0.1 * jax.random.normal(keys[2], (mid, mid, 4, 4)),      # ConvTranspose2d (Cin, Cout, 4, 4)
        bias_t=0.05 * jax.random.normal(keys[3], (mid,)),
        bnt=_bn_raw(keys[4], mid),
        w2=0.1 * jax.random.normal(keys[5], (mid, out_ch)),         # conv1x1 (bias=False)
        bn2=_bn_raw(keys[6], out_ch),
    )


def pack_block_params(raw):
    mid = raw["w1"].shape[1]
    out_ch = raw["w2"].shape[1]
    s1, t1 = _bn_fold(*raw["bn1"])
    st, tt = _bn_fold(*raw["bnt"], bias=raw["bias_t"])
    s2, t2 = _bn_fold(*raw["bn2"])

    w1f = (raw["w1"] * s1[None, :]).astype(jnp.bfloat16)
    b1 = jnp.asarray(t1, jnp.float32).reshape(1, mid)

    # Deconv: K-packed rows (9 shifts, dx-major) x phase-packed columns (p = r*2 + c).
    wt_np = np.asarray(raw["wt"], np.float32)
    st_np = np.asarray(st, np.float32)
    wd = np.zeros((9 * mid, 4 * mid), np.float32)
    gidx = 0
    for dx in (-1, 0, 1):
        for dy in (-1, 0, 1):
            for r in (0, 1):
                ky = 1 + r - 2 * dy
                if not 0 <= ky <= 3:
                    continue
                for c in (0, 1):
                    kx = 1 + c - 2 * dx
                    if not 0 <= kx <= 3:
                        continue
                    p = r * 2 + c
                    wd[gidx * mid:(gidx + 1) * mid, p * mid:(p + 1) * mid] = \
                        wt_np[:, :, ky, kx] * st_np[None, :]
            gidx += 1
    bt = np.tile(np.asarray(tt, np.float32), 4).reshape(1, 4 * mid)

    # conv1x1 #2: pair-packed over the column parity c (2x packing, not 4x block-diag).
    w2f = np.asarray(raw["w2"] * s2[None, :], np.float32)
    w2p = np.zeros((2 * mid, 2 * out_ch), np.float32)
    w2p[:mid, :out_ch] = w2f
    w2p[mid:, out_ch:] = w2f
    b2p = np.tile(np.asarray(t2, np.float32), 2).reshape(1, 2 * out_ch)

    return dict(w1=w1f, b1=b1,
                wd=jnp.asarray(wd, jnp.bfloat16), bt=jnp.asarray(bt, jnp.float32),
                w2p=jnp.asarray(w2p, jnp.bfloat16), b2p=jnp.asarray(b2p, jnp.float32))


def pack_final_w(wf):
    pf, fc = wf.shape
    wf_np = np.asarray(wf, np.float32)
    wfp = np.zeros((2 * pf, 2 * fc), np.float32)
    wfp[:pf, :fc] = wf_np
    wfp[pf:, fc:] = wf_np
    return jnp.asarray(wfp, jnp.bfloat16)


# ---------------------------------------------------------------------------
# Full decoder forward (NCHW in / NCHW out, matching the PyTorch module)
# ---------------------------------------------------------------------------
def linknet_decoder_forward(features_nchw, params):
    feats = [jnp.transpose(f, (0, 2, 3, 1)).astype(jnp.bfloat16) for f in features_nchw]
    x = feats[0]
    skips = feats[1:]
    for i in range(5):
        bp = params[f"layer{i + 1}"]
        skip = skips[i] if i < 4 else None
        final_wp = params["final_wp"] if i == 4 else None
        x = fused_block(x, skip, bp, final_wp=final_wp)
    # Dropout2d(drop_rate=0) is identity in inference; final 1x1 conv fused into block 5.
    return jnp.transpose(x, (0, 3, 1, 2))


# ---------------------------------------------------------------------------
# Pure-JAX reference (independent deconv via lax.conv_general_dilated),
# mimicking the kernel's bf16 quantization points so tolerances can stay tight.
# ---------------------------------------------------------------------------
def reference_forward(features_nchw, raws, final_w):
    hp = jax.lax.Precision.HIGHEST
    q = lambda a: a.astype(jnp.bfloat16).astype(jnp.float32)
    x = q(features_nchw[0])
    skips = [q(f) for f in features_nchw[1:]]
    for i, raw in enumerate(raws):
        s1, t1 = _bn_fold(*raw["bn1"])
        st, tt = _bn_fold(*raw["bnt"], bias=raw["bias_t"])
        s2, t2 = _bn_fold(*raw["bn2"])
        y = jnp.einsum("nchw,cm->nmhw", x, q(raw["w1"] * s1[None, :]), precision=hp)
        y = q(jax.nn.relu(y + t1[None, :, None, None]))
        wconv = jnp.flip(q(raw["wt"] * st[None, :, None, None]), (2, 3)).transpose(1, 0, 2, 3)
        up = jax.lax.conv_general_dilated(
            y, wconv, window_strides=(1, 1), padding=((2, 2), (2, 2)),
            lhs_dilation=(2, 2), dimension_numbers=("NCHW", "OIHW", "NCHW"),
            precision=hp)
        up = q(jax.nn.relu(up + tt[None, :, None, None]))
        z = jnp.einsum("nchw,cm->nmhw", up, q(raw["w2"] * s2[None, :]), precision=hp)
        z = jax.nn.relu(z + t2[None, :, None, None])
        if i < 4:
            z = z + skips[i]
        x = q(z)
    return jnp.einsum("nchw,cm->nmhw", x, q(final_w), precision=hp)


# ---------------------------------------------------------------------------
if __name__ == "__main__":
    key = jax.random.PRNGKey(0)
    kf, kp = jax.random.split(key)

    encoder_channels = (64, 32, 16, 8, 8)
    prefinal_channels, final_channels = 32, 1
    N, Hh, Wh = 4, 8, 8   # >=2 grid steps per v7x TensorCore; W a multiple of 8

    # Feature pyramid: head + 4 skips, each skip doubles spatial size.
    shapes = [(N, encoder_channels[0], Hh, Wh)]
    for i in range(1, 5):
        shapes.append((N, encoder_channels[i], Hh * 2 ** i, Wh * 2 ** i))
    fkeys = jax.random.split(kf, 5)
    features = [0.5 * jax.random.normal(fkeys[i], shapes[i], dtype=jnp.float32)
                for i in range(5)]

    # Parameters for the 5 decoder blocks + final 1x1 conv.
    pkeys = jax.random.split(kp, 6)
    chans = list(encoder_channels) + [prefinal_channels]
    raws = [init_block_raw(pkeys[i], chans[i], chans[i + 1]) for i in range(5)]
    final_w = 0.1 * jax.random.normal(pkeys[5], (prefinal_channels, final_channels))

    params = {f"layer{i + 1}": pack_block_params(raws[i]) for i in range(5)}
    params["final_wp"] = pack_final_w(final_w)

    out = jax.block_until_ready(linknet_decoder_forward(features, params))
    assert out.shape == (N, final_channels, Hh * 32, Wh * 32), out.shape
    assert bool(jnp.all(jnp.isfinite(out)))

    ref = jax.block_until_ready(reference_forward(features, raws, final_w))
    max_err = float(jnp.max(jnp.abs(out - ref)))
    assert bool(jnp.allclose(out, ref, rtol=2e-2, atol=2e-2)), f"max abs err {max_err}"
    print("KERNEL_OK")
</pallas_src>

<mosaic_0001>
module attributes {stable_mosaic.version = 11 : i64} {
  func.func @_block_kernel(%arg0: i32, %arg1: memref<1x64x64xbf16, #tpu.memory_space<vmem>>, %arg2: memref<1x8x2x8x64xbf16, #tpu.memory_space<vmem>>, %arg3: memref<64x16xbf16, #tpu.memory_space<vmem>>, %arg4: memref<1x16xf32, #tpu.memory_space<vmem>>, %arg5: memref<144x64xbf16, #tpu.memory_space<vmem>>, %arg6: memref<1x64xf32, #tpu.memory_space<vmem>>, %arg7: memref<32x64xbf16, #tpu.memory_space<vmem>>, %arg8: memref<1x64xf32, #tpu.memory_space<vmem>>, %arg9: memref<1x8x2x8x64xbf16, #tpu.memory_space<vmem>>, %arg10: memref<96x16xbf16, #tpu.memory_space<vmem>>, %arg11: memref<64x144xbf16, #tpu.memory_space<vmem>>) attributes {dimension_semantics = [#tpu.dimension_semantics<parallel>], iteration_bounds = array<i64: 4>, scalar_prefetch = 0 : i64, scratch_operands = 2 : i64, tpu.core_type = #tpu.core_type<tc>, window_params = [{transform_indices = @transform_0, window_bounds = array<i64: 1, 64, 64>}, {transform_indices = @transform_1, window_bounds = array<i64: 1, 8, 2, 8, 64>}, {pipeline_mode = #tpu.pipeline_mode<synchronous>, transform_indices = @transform_2, window_bounds = array<i64: 64, 16>}, {pipeline_mode = #tpu.pipeline_mode<synchronous>, transform_indices = @transform_3, window_bounds = array<i64: 1, 16>}, {pipeline_mode = #tpu.pipeline_mode<synchronous>, transform_indices = @transform_4, window_bounds = array<i64: 144, 64>}, {pipeline_mode = #tpu.pipeline_mode<synchronous>, transform_indices = @transform_5, window_bounds = array<i64: 1, 64>}, {pipeline_mode = #tpu.pipeline_mode<synchronous>, transform_indices = @transform_6, window_bounds = array<i64: 32, 64>}, {pipeline_mode = #tpu.pipeline_mode<synchronous>, transform_indices = @transform_7, window_bounds = array<i64: 1, 64>}, {transform_indices = @transform_8, window_bounds = array<i64: 1, 8, 2, 8, 64>}]} {
    %c0 = arith.constant 0 : index
    %c0_0 = arith.constant 0 : index
    %c0_1 = arith.constant 0 : index
    %0 = vector.load %arg1[%c0, %c0_0, %c0_1] : memref<1x64x64xbf16, #tpu.memory_space<vmem>>, vector<1x64x64xbf16>
    %1 = vector.shape_cast %0 : vector<1x64x64xbf16> to vector<64x64xbf16>
    %c0_2 = arith.constant 0 : index
    %c0_3 = arith.constant 0 : index
    %2 = vector.load %arg3[%c0_2, %c0_3] : memref<64x16xbf16, #tpu.memory_space<vmem>>, vector<64x16xbf16>
    %cst = arith.constant dense<0.000000e+00> : vector<64x16xf32>
    %3 = tpu.matmul %1, %2, %cst {dimension_numbers = #tpu.dot_dimension_numbers<[1], [0], [0], [1], [0, 0, 1, 1], [], []>} : vector<64x64xbf16>, vector<64x16xbf16>, vector<64x16xf32> -> vector<64x16xf32>
    %c0_4 = arith.constant 0 : index
    %c0_5 = arith.constant 0 : index
    %4 = vector.load %arg4[%c0_4, %c0_5] : memref<1x16xf32, #tpu.memory_space<vmem>>, vector<1x16xf32>
    %5 = vector.broadcast %4 : vector<1x16xf32> to vector<64x16xf32>
    %6 = arith.addf %3, %5 : vector<64x16xf32>
    %cst_6 = arith.constant 0.000000e+00 : f32
    %7 = vector.broadcast %cst_6 : f32 to vector<64x16xf32>
    %8 = arith.maximumf %6, %7 : vector<64x16xf32>
    %cst_7 = arith.constant 0.000000e+00 : bf16
    %9 = vector.broadcast %cst_7 : bf16 to vector<16x16xbf16>
    %c0_8 = arith.constant 0 : index
    %c0_9 = arith.constant 0 : index
    %10 = vector.load %arg10[%c0_8, %c0_9] : memref<96x16xbf16, #tpu.memory_space<vmem>>, vector<16x16xbf16>
    tpu.vector_store %arg10[%c0_8, %c0_9], %9 {strides = array<i32>} : memref<96x16xbf16, #tpu.memory_space<vmem>>, vector<16x16xbf16>,
    %cst_10 = arith.constant 0.000000e+00 : bf16
    %11 = vector.broadcast %cst_10 : bf16 to vector<16x16xbf16>
    %c80 = arith.constant 80 : index
    %c0_11 = arith.constant 0 : index
    %12 = vector.load %arg10[%c80, %c0_11] : memref<96x16xbf16, #tpu.memory_space<vmem>>, vector<16x16xbf16>
    tpu.vector_store %arg10[%c80, %c0_11], %11 {strides = array<i32>} : memref<96x16xbf16, #tpu.memory_space<vmem>>, vector<16x16xbf16>,
    %13 = arith.truncf %8 : vector<64x16xf32> to vector<64x16xbf16>
    %c16 = arith.constant 16 : index
    %c0_12 = arith.constant 0 : index
    %14 = vector.load %arg10[%c16, %c0_12] : memref<96x16xbf16, #tpu.memory_space<vmem>>, vector<64x16xbf16>
    tpu.vector_store %arg10[%c16, %c0_12], %13 {strides = array<i32>} : memref<96x16xbf16, #tpu.memory_space<vmem>>, vector<64x16xbf16>,
    %15 = tpu.iota {dimensions = array<i32: 0>} : vector<64x1xi32>
    %c8_i32 = arith.constant 8 : i32
    %c0_i32 = arith.constant 0 : i32
    %16 = arith.cmpi eq, %c8_i32, %c0_i32 : i32
    %c1_i32 = arith.constant 1 : i32
    %17 = arith.select %16, %c1_i32, %c8_i32 : i32
    %18 = vector.broadcast %17 : i32 to vector<64x1xi32>
    %19 = arith.remsi %15, %18 : vector<64x1xi32>
    %c0_i32_13 = arith.constant 0 : i32
    %20 = vector.broadcast %c0_i32_13 : i32 to vector<64x1xi32>
    %21 = arith.cmpi ne, %19, %20 : vector<64x1xi32>
    %c0_i32_14 = arith.constant 0 : i32
    %22 = vector.broadcast %c0_i32_14 : i32 to vector<64x1xi32>
    %23 = arith.cmpi slt, %19, %22 : vector<64x1xi32>
    %c0_i32_15 = arith.constant 0 : i32
    %24 = arith.cmpi slt, %17, %c0_i32_15 : i32
    %25 = vector.broadcast %24 : i1 to vector<64x1xi1>
    %26 = vector.broadcast %25 : vector<64x1xi1> to vector<64x1xi1>
    %27 = arith.xori %23, %26 : vector<64x1xi1>
    %28 = arith.andi %27, %21 : vector<64x1xi1>
    %29 = vector.broadcast %17 : i32 to vector<64x1xi32>
    %30 = arith.addi %19, %29 : vector<64x1xi32>
    %31 = arith.select %28, %30, %19 : vector<64x1xi1>, vector<64x1xi32>
    %c0_i32_16 = arith.constant 0 : i32
    %32 = vector.broadcast %c0_i32_16 : i32 to vector<64x1xi32>
    %33 = arith.cmpi sgt, %31, %32 : vector<64x1xi32>
    %34 = arith.extui %33 : vector<64x1xi1> to vector<64x1xi32>
    %35 = arith.sitofp %34 : vector<64x1xi32> to vector<64x1xf32>
    %36 = arith.truncf %35 : vector<64x1xf32> to vector<64x1xbf16>
    %c7_i32 = arith.constant 7 : i32
    %37 = vector.broadcast %c7_i32 : i32 to vector<64x1xi32>
    %38 = arith.cmpi slt, %31, %37 : vector<64x1xi32>
    %39 = arith.extui %38 : vector<64x1xi1> to vector<64x1xi32>
    %40 = arith.sitofp %39 : vector<64x1xi32> to vector<64x1xf32>
    %41 = arith.truncf %40 : vector<64x1xf32> to vector<64x1xbf16>
    %c7 = arith.constant 7 : index
    %c0_17 = arith.constant 0 : index
    %42 = vector.load %arg10[%c7, %c0_17] : memref<96x16xbf16, #tpu.memory_space<vmem>>, vector<64x16xbf16>
    %43 = vector.broadcast %36 : vector<64x1xbf16> to vector<64x16xbf16>
    %44 = arith.mulf %42, %43 : vector<64x16xbf16>
    %c0_18 = arith.constant 0 : index
    %c0_19 = arith.constant 0 : index
    %45 = vector.load %arg11[%c0_18, %c0_19] : memref<64x144xbf16, #tpu.memory_space<vmem>>, vector<64x16xbf16>
    tpu.vector_store %arg11[%c0_18, %c0_19], %44 {strides = array<i32>} : memref<64x144xbf16, #tpu.memory_space<vmem>>, vector<64x16xbf16>,
    %c15 = arith.constant 15 : index
    %c0_20 = arith.constant 0 : index
    %46 = vector.load %arg10[%c15, %c0_20] : memref<96x16xbf16, #tpu.memory_space<vmem>>, vector<64x16xbf16>
    %47 = vector.broadcast %36 : vector<64x1xbf16> to vector<64x16xbf16>
    %48 = arith.mulf %46, %47 : vector<64x16xbf16>
    %c0_21 = arith.constant 0 : index
    %c16_22 = arith.constant 16 : index
    %49 = vector.load %arg11[%c0_21, %c16_22] : memref<64x144xbf16, #tpu.memory_space<vmem>>, vector<64x16xbf16>
    tpu.vector_store %arg11[%c0_21, %c16_22], %48 {strides = array<i32>} : memref<64x144xbf16, #tpu.memory_space<vmem>>, vector<64x16xbf16>,
    %c23 = arith.constant 23 : index
    %c0_23 = arith.constant 0 : index
    %50 = vector.load %arg10[%c23, %c0_23] : memref<96x16xbf16, #tpu.memory_space<vmem>>, vector<64x16xbf16>
    %51 = vector.broadcast %36 : vector<64x1xbf16> to vector<64x16xbf16>
    %52 = arith.mulf %50, %51 : vector<64x16xbf16>
    %c0_24 = arith.constant 0 : index
    %c32 = arith.constant 32 : index
    %53 = vector.load %arg11[%c0_24, %c32] : memref<64x144xbf16, #tpu.memory_space<vmem>>, vector<64x16xbf16>
    tpu.vector_store %arg11[%c0_24, %c32], %52 {strides = array<i32>} : memref<64x144xbf16, #tpu.memory_space<vmem>>, vector<64x16xbf16>,
    %c8 = arith.constant 8 : index
    %c0_25 = arith.constant 0 : index
    %54 = vector.load %arg10[%c8, %c0_25] : memref<96x16xbf16, #tpu.memory_space<vmem>>, vector<64x16xbf16>
    %c0_26 = arith.constant 0 : index
    %c48 = arith.constant 48 : index
    %55 = vector.load %arg11[%c0_26, %c48] : memref<64x144xbf16, #tpu.memory_space<vmem>>, vector<64x16xbf16>
    tpu.vector_store %arg11[%c0_26, %c48], %54 {strides = array<i32>} : memref<64x144xbf16, #tpu.memory_space<vmem>>, vector<64x16xbf16>,
    %c16_27 = arith.constant 16 : index
    %c0_28 = arith.constant 0 : index
    %56 = vector.load %arg10[%c16_27, %c0_28] : memref<96x16xbf16, #tpu.memory_space<vmem>>, vector<64x16xbf16>
    %c0_29 = arith.constant 0 : index
    %c64 = arith.constant 64 : index
    %57 = vector.load %arg11[%c0_29, %c64] : memref<64x144xbf16, #tpu.memory_space<vmem>>, vector<64x16xbf16>
    tpu.vector_store %arg11[%c0_29, %c64], %56 {strides = array<i32>} : memref<64x144xbf16, #tpu.memory_space<vmem>>, vector<64x16xbf16>,
    %c24 = arith.constant 24 : index
    %c0_30 = arith.constant 0 : index
    %58 = vector.load %arg10[%c24, %c0_30] : memref<96x16xbf16, #tpu.memory_space<vmem>>, vector<64x16xbf16>
    %c0_31 = arith.constant 0 : index
    %c80_32 = arith.constant 80 : index
    %59 = vector.load %arg11[%c0_31, %c80_32] : memref<64x144xbf16, #tpu.memory_space<vmem>>, vector<64x16xbf16>
    tpu.vector_store %arg11[%c0_31, %c80_32], %58 {strides = array<i32>} : memref<64x144xbf16, #tpu.memory_space<vmem>>, vector<64x16xbf16>,
    %c9 = arith.constant 9 : index
    %c0_33 = arith.constant 0 : index
    %60 = vector.load %arg10[%c9, %c0_33] : memref<96x16xbf16, #tpu.memory_space<vmem>>, vector<64x16xbf16>
    %61 = vector.broadcast %41 : vector<64x1xbf16> to vector<64x16xbf16>
    %62 = arith.mulf %60, %61 : vector<64x16xbf16>
    %c0_34 = arith.constant 0 : index
    %c96 = arith.constant 96 : index
    %63 = vector.load %arg11[%c0_34, %c96] : memref<64x144xbf16, #tpu.memory_space<vmem>>, vector<64x16xbf16>
    tpu.vector_store %arg11[%c0_34, %c96], %62 {strides = array<i32>} : memref<64x144xbf16, #tpu.memory_space<vmem>>, vector<64x16xbf16>,
    %c17 = arith.constant 17 : index
    %c0_35 = arith.constant 0 : index
    %64 = vector.load %arg10[%c17, %c0_35] : memref<96x16xbf16, #tpu.memory_space<vmem>>, vector<64x16xbf16>
    %65 = vector.broadcast %41 : vector<64x1xbf16> to vector<64x16xbf16>
    %66 = arith.mulf %64, %65 : vector<64x16xbf16>
    %c0_36 = arith.constant 0 : index
    %c112 = arith.constant 112 : index
    %67 = vector.load %arg11[%c0_36, %c112] : memref<64x144xbf16, #tpu.memory_space<vmem>>, vector<64x16xbf16>
    tpu.vector_store %arg11[%c0_36, %c112], %66 {strides = array<i32>} : memref<64x144xbf16, #tpu.memory_space<vmem>>, vector<64x16xbf16>,
    %c25 = arith.constant 25 : index
    %c0_37 = arith.constant 0 : index
    %68 = vector.load %arg10[%c25, %c0_37] : memref<96x16xbf16, #tpu.memory_space<vmem>>, vector<64x16xbf16>
    %69 = vector.broadcast %41 : vector<64x1xbf16> to vector<64x16xbf16>
    %70 = arith.mulf %68, %69 : vector<64x16xbf16>
    %c0_38 = arith.constant 0 : index
    %c128 = arith.constant 128 : index
    %71 = vector.load %arg11[%c0_38, %c128] : memref<64x144xbf16, #tpu.memory_space<vmem>>, vector<64x16xbf16>
    tpu.vector_store %arg11[%c0_38, %c128], %70 {strides = array<i32>} : memref<64x144xbf16, #tpu.memory_space<vmem>>, vector<64x16xbf16>,
    %c0_39 = arith.constant 0 : index
    %c0_40 = arith.constant 0 : index
    %72 = vector.load %arg11[%c0_39, %c0_40] : memref<64x144xbf16, #tpu.memory_space<vmem>>, vector<64x144xbf16>
    %c0_41 = arith.constant 0 : index
    %c0_42 = arith.constant 0 : index
    %73 = vector.load %arg5[%c0_41, %c0_42] : memref<144x64xbf16, #tpu.memory_space<vmem>>, vector<144x64xbf16>
    %cst_43 = arith.constant dense<0.000000e+00> : vector<64x64xf32>
    %74 = tpu.matmul %72, %73, %cst_43 {dimension_numbers = #tpu.dot_dimension_numbers<[1], [0], [0], [1], [0, 0, 1, 1], [], []>} : vector<64x144xbf16>, vector<144x64xbf16>, vector<64x64xf32> -> vector<64x64xf32>
    %c0_44 = arith.constant 0 : index
    %c0_45 = arith.constant 0 : index
    %75 = vector.load %arg6[%c0_44, %c0_45] : memref<1x64xf32, #tpu.memory_space<vmem>>, vector<1x64xf32>
    %76 = vector.broadcast %75 : vector<1x64xf32> to vector<64x64xf32>
    %77 = arith.addf %74, %76 : vector<64x64xf32>
    %cst_46 = arith.constant 0.000000e+00 : f32
    %78 = vector.broadcast %cst_46 : f32 to vector<64x64xf32>
    %79 = arith.maximumf %77, %78 : vector<64x64xf32>
    %80 = arith.truncf %79 : vector<64x64xf32> to vector<64x64xbf16>
    %81 = vector.extract_strided_slice %80 {offsets = [0, 0], sizes = [64, 32], strides = [1, 1]} : vector<64x64xbf16> to vector<64x32xbf16>
    %c0_47 = arith.constant 0 : index
    %c0_48 = arith.constant 0 : index
    %82 = vector.load %arg7[%c0_47, %c0_48] : memref<32x64xbf16, #tpu.memory_space<vmem>>, vector<32x64xbf16>
    %cst_49 = arith.constant dense<0.000000e+00> : vector<64x64xf32>
    %83 = tpu.matmul %81, %82, %cst_49 {dimension_numbers = #tpu.dot_dimension_numbers<[1], [0], [0], [1], [0, 0, 1, 1], [], []>} : vector<64x32xbf16>, vector<32x64xbf16>, vector<64x64xf32> -> vector<64x64xf32>
    %c0_50 = arith.constant 0 : index
    %c0_51 = arith.constant 0 : index
    %84 = vector.load %arg8[%c0_50, %c0_51] : memref<1x64xf32, #tpu.memory_space<vmem>>, vector<1x64xf32>
    %85 = vector.broadcast %84 : vector<1x64xf32> to vector<64x64xf32>
    %86 = arith.addf %83, %85 : vector<64x64xf32>
    %cst_52 = arith.constant 0.000000e+00 : f32
    %87 = vector.broadcast %cst_52 : f32 to vector<64x64xf32>
    %88 = arith.maximumf %86, %87 : vector<64x64xf32>
    %89 = vector.shape_cast %88 : vector<64x64xf32> to vector<8x8x64xf32>
    %c0_53 = arith.constant 0 : index
    %c0_54 = arith.constant 0 : index
    %c0_55 = arith.constant 0 : index
    %c0_56 = arith.constant 0 : index
    %c0_57 = arith.constant 0 : index
    %90 = vector.load %arg2[%c0_53, %c0_54, %c0_55, %c0_56, %c0_57] : memref<1x8x2x8x64xbf16, #tpu.memory_space<vmem>>, vector<1x8x1x8x64xbf16>
    %91 = vector.shape_cast %90 : vector<1x8x1x8x64xbf16> to vector<8x8x64xbf16>
    %92 = arith.extf %91 : vector<8x8x64xbf16> to vector<8x8x64xf32>
    %93 = arith.addf %89, %92 : vector<8x8x64xf32>
    %94 = arith.truncf %93 : vector<8x8x64xf32> to vector<8x8x64xbf16>
    %c0_58 = arith.constant 0 : index
    %c0_59 = arith.constant 0 : index
    %c0_60 = arith.constant 0 : index
    %c0_61 = arith.constant 0 : index
    %c0_62 = arith.constant 0 : index
    %95 = vector.load %arg9[%c0_58, %c0_59, %c0_60, %c0_61, %c0_62] : memref<1x8x2x8x64xbf16, #tpu.memory_space<vmem>>, vector<1x8x1x8x64xbf16>
    %96 = vector.shape_cast %95 : vector<1x8x1x8x64xbf16> to vector<8x8x64xbf16>
    %97 = vector.shape_cast %94 : vector<8x8x64xbf16> to vector<1x8x1x8x64xbf16>
    tpu.vector_store %arg9[%c0_58, %c0_59, %c0_60, %c0_61, %c0_62], %97 {strides = array<i32>} : memref<1x8x2x8x64xbf16, #tpu.memory_space<vmem>>, vector<1x8x1x8x64xbf16>,
    %98 = vector.extract_strided_slice %80 {offsets = [0, 32], sizes = [64, 32], strides = [1, 1]} : vector<64x64xbf16> to vector<64x32xbf16>
    %c0_63 = arith.constant 0 : index
    %c0_64 = arith.constant 0 : index
    %99 = vector.load %arg7[%c0_63, %c0_64] : memref<32x64xbf16, #tpu.memory_space<vmem>>, vector<32x64xbf16>
    %cst_65 = arith.constant dense<0.000000e+00> : vector<64x64xf32>
    %100 = tpu.matmul %98, %99, %cst_65 {dimension_numbers = #tpu.dot_dimension_numbers<[1], [0], [0], [1], [0, 0, 1, 1], [], []>} : vector<64x32xbf16>, vector<32x64xbf16>, vector<64x64xf32> -> vector<64x64xf32>
    %c0_66 = arith.constant 0 : index
    %c0_67 = arith.constant 0 : index
    %101 = vector.load %arg8[%c0_66, %c0_67] : memref<1x64xf32, #tpu.memory_space<vmem>>, vector<1x64xf32>
    %102 = vector.broadcast %101 : vector<1x64xf32> to vector<64x64xf32>
    %103 = arith.addf %100, %102 : vector<64x64xf32>
    %cst_68 = arith.constant 0.000000e+00 : f32
    %104 = vector.broadcast %cst_68 : f32 to vector<64x64xf32>
    %105 = arith.maximumf %103, %104 : vector<64x64xf32>
    %106 = vector.shape_cast %105 : vector<64x64xf32> to vector<8x8x64xf32>
    %c0_69 = arith.constant 0 : index
    %c0_70 = arith.constant 0 : index
    %c1 = arith.constant 1 : index
    %c0_71 = arith.constant 0 : index
    %c0_72 = arith.constant 0 : index
    %107 = vector.load %arg2[%c0_69, %c0_70, %c1, %c0_71, %c0_72] : memref<1x8x2x8x64xbf16, #tpu.memory_space<vmem>>, vector<1x8x1x8x64xbf16>
    %108 = vector.shape_cast %107 : vector<1x8x1x8x64xbf16> to vector<8x8x64xbf16>
    %109 = arith.extf %108 : vector<8x8x64xbf16> to vector<8x8x64xf32>
    %110 = arith.addf %106, %109 : vector<8x8x64xf32>
    %111 = arith.truncf %110 : vector<8x8x64xf32> to vector<8x8x64xbf16>
    %c0_73 = arith.constant 0 : index
    %c0_74 = arith.constant 0 : index
    %c1_75 = arith.constant 1 : index
    %c0_76 = arith.constant 0 : index
    %c0_77 = arith.constant 0 : index
    %112 = vector.load %arg9[%c0_73, %c0_74, %c1_75, %c0_76, %c0_77] : memref<1x8x2x8x64xbf16, #tpu.memory_space<vmem>>, vector<1x8x1x8x64xbf16>
    %113 = vector.shape_cast %112 : vector<1x8x1x8x64xbf16> to vector<8x8x64xbf16>
    %114 = vector.shape_cast %111 : vector<8x8x64xbf16> to vector<1x8x1x8x64xbf16>
    tpu.vector_store %arg9[%c0_73, %c0_74, %c1_75, %c0_76, %c0_77], %114 {strides = array<i32>} : memref<1x8x2x8x64xbf16, #tpu.memory_space<vmem>>, vector<1x8x1x8x64xbf16>,
    return
  }
  func.func @transform_0(%arg0: i32) -> (i32, i32, i32) {
    %c0_i32 = arith.constant 0 : i32
    %c0_i32_0 = arith.constant 0 : i32
    %c0_i32_1 = arith.constant 0 : i32
    return %arg0, %c0_i32, %c0_i32_0 : i32, i32, i32
  }
  func.func @transform_1(%arg0: i32) -> (i32, i32, i32, i32, i32) {
    %c0_i32 = arith.constant 0 : i32
    %c0_i32_0 = arith.constant 0 : i32
    %c0_i32_1 = arith.constant 0 : i32
    %c0_i32_2 = arith.constant 0 : i32
    %c0_i32_3 = arith.constant 0 : i32
    return %arg0, %c0_i32, %c0_i32_0, %c0_i32_1, %c0_i32_2 : i32, i32, i32, i32, i32
  }
  func.func @transform_2(%arg0: i32) -> (i32, i32) {
    %c0_i32 = arith.constant 0 : i32
    %c0_i32_0 = arith.constant 0 : i32
    %c0_i32_1 = arith.constant 0 : i32
    return %c0_i32, %c0_i32_0 : i32, i32
  }
  func.func @transform_3(%arg0: i32) -> (i32, i32) {
    %c0_i32 = arith.constant 0 : i32
    %c0_i32_0 = arith.constant 0 : i32
    %c0_i32_1 = arith.constant 0 : i32
    return %c0_i32, %c0_i32_0 : i32, i32
  }
  func.func @transform_4(%arg0: i32) -> (i32, i32) {
    %c0_i32 = arith.constant 0 : i32
    %c0_i32_0 = arith.constant 0 : i32
    %c0_i32_1 = arith.constant 0 : i32
    return %c0_i32, %c0_i32_0 : i32, i32
  }
  func.func @transform_5(%arg0: i32) -> (i32, i32) {
    %c0_i32 = arith.constant 0 : i32
    %c0_i32_0 = arith.constant 0 : i32
    %c0_i32_1 = arith.constant 0 : i32
    return %c0_i32, %c0_i32_0 : i32, i32
  }
  func.func @transform_6(%arg0: i32) -> (i32, i32) {
    %c0_i32 = arith.constant 0 : i32
    %c0_i32_0 = arith.constant 0 : i32
    %c0_i32_1 = arith.constant 0 : i32
    return %c0_i32, %c0_i32_0 : i32, i32
  }
  func.func @transform_7(%arg0: i32) -> (i32, i32) {
    %c0_i32 = arith.constant 0 : i32
    %c0_i32_0 = arith.constant 0 : i32
    %c0_i32_1 = arith.constant 0 : i32
    return %c0_i32, %c0_i32_0 : i32, i32
  }
  func.func @transform_8(%arg0: i32) -> (i32, i32, i32, i32, i32) {
    %c0_i32 = arith.constant 0 : i32
    %c0_i32_0 = arith.constant 0 : i32
    %c0_i32_1 = arith.constant 0 : i32
    %c0_i32_2 = arith.constant 0 : i32
    %c0_i32_3 = arith.constant 0 : i32
    return %arg0, %c0_i32, %c0_i32_0, %c0_i32_1, %c0_i32_2 : i32, i32, i32, i32, i32
  }
}

</mosaic_0001>

<bundles_post_ra>
// kernel: tpu_custom_call.1
= control target key start
LH: loop header
LB: loop body
LE: loop exit
PB: predicated region body
PF: predicated region fallthrough
CT: control target
= control target key end

     0   :  { %13 = vsyncpa [#allocation5], 0  ;;  %s3019_s0 = inlined_call_operand.vmem [shape: bf16[4,64,64], index: 0, kind: input, shape index: {}]   ;;  %s3020_s1 = inlined_call_operand.hbm [shape: bf16[4,8,2,8,64], index: 1, kind: input, shape index: {}]   ;;  %s3021_s2 = inlined_call_operand.vmem [shape: bf16[64,16], index: 2, kind: input, shape index: {}]   ;;  %s3022_s3 = inlined_call_operand.vmem [shape: f32[1,16], index: 3, kind: input, shape index: {}]   ;;  %s3023_s4 = inlined_call_operand.vmem [shape: bf16[144,64], index: 4, kind: input, shape index: {}]   ;;  %s3024_s5 = inlined_call_operand.vmem [shape: f32[1,64], index: 5, kind: input, shape index: {}]   ;;  %s3025_s6 = inlined_call_operand.vmem [shape: bf16[32,64], index: 6, kind: input, shape index: {}]   ;;  %s3026_s7 = inlined_call_operand.vmem [shape: f32[1,64], index: 7, kind: input, shape index: {}]   ;;  %s3027_s8 = inlined_call_operand.hbm [shape: bf16[4,8,2,8,64], index: 8, kind: output, shape index: {}]  }
   0x1   :  { %15 = vsyncpa [#allocation5 + $0x1], 0 }
   0x2   :  { %16 = vsyncpa [#allocation6], 0 }
   0x3   :  { %18 = vsyncpa [#allocation6 + $0x1], 0  ;;  %s2251_s27 = smov 0   ;;  %s2253_s28 = smov 0  }
   0x4   :  { %s2255_s29 = smov 0   ;;  %s2257_s30 = smov 0  }
   0x5 LB: > { %s2272_s9 = sadd.s32 4294967295, %s2190_s30   ;;  %s1863_s10 = sadd.s32 4294967294, %s2190_s30   ;;  %s2190_s30 = sphi %s2257_s30, %s3045_s30   ;;  %s2186_s29 = sphi %s2255_s29, %s3044_s29   ;;  %s2182_s28 = sphi %s2253_s28, %s3043_s28   ;;  %s2178_s27 = sphi %s2251_s27, %s3042_s27  }
   0x6   : > { %s2276_s11 = sadd.s32 1, %s2190_s30   ;;  %s57_s12 = sadd.s32 1, %s2186_s29 }
   0x7   : > { %s54_s13 = ssub.s32 %s2190_s30, %s2276_s11  ;;  %p64_p0 = scmp.ne.s32.totalorder %s2186_s29, %s2182_s28 }
   0x8   : > { %p55_p1 = scmp.eq.s32.totalorder %s54_s13, 0  ;;  %p65_p2 = scmp.eq.s32.totalorder %s2190_s30, 0 }
   0x9   : > { %p70_p3 = scmp.ne.s32.totalorder %s2182_s28, %s2178_s27  ;;  %p71_p4 = scmp.eq.s32.totalorder %s2272_s9, 0 }
   0xa   : > { %s2288_s14 = scalar_select %p55_p1, %s2186_s29, %s57_s12  }
   0xb   : > { %p2290_p5 = por %p65_p2, %p64_p0  ;;  %p2294_p6 = por %p71_p4, %p70_p3 }
   0xc   : > { %p220_p7 = scmp.eq.s32.totalorder %s2272_s9, 3  ;;  %p226_p8 = scmp.eq.s32.totalorder %s1863_s10, 3 }
   0xd   : > { %p2027_p9 = scmp.lt.s32.totalorder %s2190_s30, 4  ;;  %s272_s19 = sand.u32 1, %s2186_s29  }
   0xe   : > { %p2300_p10 = por %p220_p7, %p64_p0  ;;  %p2304_p11 = por %p226_p8, %p70_p3 }
   0xf   : > { %s1952_s20 = sshll.u32 %s2190_s30, 10  ;;  %s1866_s21 = sshll.u32 %s272_s19, 6 }
  0x10   : > { %s3032_s17 = scalar_select %p2300_p10, 1, 0 }
  0x11   : > { %s3033_s18 = scalar_select %p2304_p11, 1, 0 }
  0x12   : > { %s2313_s24 = scalar_lea.hbm %s3020_s1, %s1952_s20  ;;  %s276_s25 = scalar_lea.vmem [#allocation4], %s1866_s21 }
  0x13   : > { %s283_s26 = sshll.u32 %s276_s25, 4  ;;  %p2317_p12 = pnand %p2027_p9, %p2290_p5  ;;  %s2321_s26 = int_to_ptr.vmem [resolvable:$true] %s283_s26 }
  0x14   : > { %s2323_s12 = scalar_lea.sflag [#allocation5], %s272_s19  ;;  %s2094_s13 = scalar_lea.hbm %s2313_s24, 1024 }
  0x15   : > { %p2095_p13 = scmp.ne.s32.totalorder %s2313_s24, %s2094_s13  ;;  %p2096_p0 = pneg %p2317_p12 }
  0x16   : > { %s2099_s21 = scalar_lea.hbm %s3020_s1, 4096  ;;  %p2100_p3 = scmp.lt.u32.totalorder %s2313_s24, %s3020_s1 }
  0x17   : > { %p2097_p1 = pnand %p2096_p0, %p2095_p13  ;;  %p2101_p4 = scmp.lt.u32.totalorder %s2099_s21, %s2094_s13 }
  0x18   : > { %p2103_p7 = scmp.lt.u32.totalorder %s2094_s13, %s2313_s24 }
  0x19   : > { %p2098_p2 = pneg %p2097_p1  ;;  %p2102_p5 = por %p2101_p4, %p2100_p3 }
  0x1b   : > { %p2104_p8 = por %p2103_p7, %p2102_p5 }
  0x1d   : > { %p2105_p9 = pnand %p2104_p8, %p2098_p2 }
  0x1f   : > { %2108 = shalt.err (!%p2105_p9)
}
  0x20   : > { %s2109_s19 = scalar_lea.vmem %s2321_s26, 1024  ;;  %s2192_s25 = smov [#allocation4]  }
  0x21   : > { %p2110_p13 = scmp.ne.s32.totalorder %s2321_s26, %s2109_s19  ;;  %s2114_s20 = sshll.u32 %s2192_s25, 4  ;;  %s2115_s20 = int_to_ptr.vmem [resolvable:$false] %s2114_s20 }
  0x22   : > { %s2116_s15 = scalar_lea.vmem %s2115_s20, 2048  ;;  %p2117_p10 = scmp.lt.s32.totalorder %s2321_s26, %s2115_s20 }
  0x23   : > { %p2112_p1 = pnand %p2110_p13, %p2096_p0  ;;  %p2118_p3 = scmp.lt.s32.totalorder %s2116_s15, %s2109_s19 }
  0x25   : > { %p2113_p11 = pneg %p2112_p1  ;;  %p2119_p4 = por %p2118_p3, %p2117_p10 }
  0x27   : > { %p2120_p5 = pnand %p2119_p4, %p2113_p11 }
  0x29   : > { %2123 = shalt.err (!%p2120_p5)
}
  0x2a   : > { %s2193_s13 = smov 64   ;;  %s2194_s21 = smov 4  }
  0x2b   : > { %2022 = dma.hbm_to_vmem [thread:$0]  (!%p2317_p12), %s2313_s24, 1024, %s2321_s26, %s2323_s12, %s2193_s13, %s2193_s13, %s2194_s21  }
  0x2c   : > { %p1869_p0 = scmp.ge.s32.totalorder %s2190_s30, 1  ;;  %p291_p2 = scmp.lt.s32.totalorder %s2190_s30, 5 }
  0x2e   : > { %p292_p7 = pnand %p1869_p0, %p291_p2 }
  0x2f   : > { %s2354_s22 = sand.u32 (!%p292_p7), 1, %s2182_s28  }
  0x30   : > { %295 = sbr.rel (%p292_p7) target bundleno = 1055 (0x41f), region = 52  ;;  %s3029_s23 = sshll.u32 (!%p292_p7), %s2354_s22, 6 }
  0x31   : > { %s298_s19 = scalar_lea.sflag (!%p292_p7), [#allocation5], %s2354_s22  ;;  %s2360_s25 = scalar_lea.vmem (!%p292_p7), [#allocation4], %s3029_s23 }
  0x37   : > { %2169 = dma.done.wait (%p2294_p6), %s298_s19, 1024  }
  0x38   : > { %2171 = vsyncadd (%p2294_p6), %s298_s19, 4294966272  ;;  %p339_p10 = scmp.lt.s32.totalorder %s2272_s9, 3  ;;  %v2073_v0 = vld [vmem:[%s3021_s2] sm:$0xff]   ;;  %v2074_v1 = vld [vmem:[%s3021_s2 + $0x8] sm:$0xff]   ;;  %vm412_vm0 = vcmask 523264   ;;  %vm498_vm1 = vcmask 130048   ;;  %v509_v11 = vlaneseq }
  0x39   : > { %1975 = vmatprep.subr.bf16.mxu0 %v2073_v0  ;;  %v2075_v2 = vld [vmem:[%s3021_s2 + $0x10] sm:$0xff]   ;;  %v2076_v4 = vld [vmem:[%s3021_s2 + $0x18] sm:$0xff]   ;;  %v2195_v8 = vmov 0   ;;  %v2081_v9 = vld [vmem:[%s3023_s4] sm:$0xff]   ;;  %v2196_v20 = vmov 0.0   ;;  %s2197_s12 = smov 64  }
  0x3a   : > { %s340_s24 = scalar_select %p339_p10, %s2272_s9, 3  ;;  %1976 = vmatpush3.bf16.msra.mxu0 %v2073_v0  ;;  %499 = vst.msk [vmem:[#allocation2] sm:$0xff] %vm498_vm1, %v2195_v8  ;;  %500 = vst.msk [vmem:[#allocation2 + $0x28] sm:$0xff] %vm498_vm1, %v2195_v8  ;;  %1375 = vmatprep.subr.bf16.mxu1 %v2195_v8  ;;  %v2082_v10 = vld [vmem:[%s3023_s4 + $0x8] sm:$0xff]   ;;  %v510_v12 = vshrl.u32 %v509_v11, 7 }
  0x3b   : > { %1977 = vmatprep.subr.bf16.mxu0 %v2074_v1  ;;  %1376 = vmatpush1.bf16.msra.mxu1 %v2081_v9  ;;  %vm721_vm12 = vsmask.f32 4352  ;;  %vm779_vm15 = vsmask.f32 7424  ;;  %s2199_s13 = smov 48   ;;  %s2200_s10 = smov 16  }
  0x3c   : > { %s1953_s26 = sshll.u32 %s340_s24, 5  ;;  %1377 = vmatprep.subr.bf16.mxu1 %v2195_v8  ;;  %v511_v13 = vadd.s32 8, %v510_v12  ;;  %v512_v14 = vadd.s32 16, %v510_v12  ;;  %v513_v15 = vadd.s32 24, %v510_v12  ;;  %v522_v16 = vand.u32 7, %v510_v12  ;;  %s2201_s15 = smov 32  }
  0x3d   : > { %s343_s23 = scalar_lea.vmem %s3019_s0, %s1953_s26  ;;  %v514_v23 = vadd.s32 32, %v510_v12  ;;  %v515_v27 = vadd.s32 40, %v510_v12  ;;  %v516_v39 = vadd.s32 48, %v510_v12  ;;  %v517_v40 = vadd.s32 56, %v510_v12  ;;  %s2202_s21 = smov 112  }
  0x3e   : > { %v2077_v3 = vld [vmem:[%s343_s23] sm:$0xff]   ;;  %1978 = vmatpush3.bf16.msra.mxu0 %v2074_v1  ;;  %v2078_v5 = vld [vmem:[%s343_s23 + $0x8] sm:$0xff]   ;;  %v2079_v6 = vld [vmem:[%s343_s23 + $0x10] sm:$0xff]   ;;  %v529_v17 = vand.u32 7, %v511_v13  ;;  %v536_v18 = vand.u32 7, %v512_v14  ;;  %v543_v19 = vand.u32 7, %v513_v15 }
  0x3f   : > { %1983 = vmatprep.mubr.msk.bf16.mxu0 %vm412_vm0, %v2077_v3  ;;  %1979 = vmatprep.subr.bf16.mxu0 %v2075_v2  ;;  %v2080_v7 = vld [vmem:[%s343_s23 + $0x18] sm:$0xff]   ;;  %vm614_vm2 = vcmp.gt.s32.totalorder %v522_v16, 0  ;;  %vm642_vm6 = vcmp.lt.s32.totalorder %v522_v16, 7  ;;  %v550_v35 = vand.u32 7, %v514_v23  ;;  %v557_v37 = vand.u32 7, %v515_v27  ;;  %s2198_s23 = smov 80  }
  0x40   : > { %1378 = vmatpush1.bf16.msra.mxu1 %v2082_v10  ;;  %vm615_vm3 = vcmp.gt.s32.totalorder %v529_v17, 0  ;;  %vm616_vm4 = vcmp.gt.s32.totalorder %v536_v18, 0  ;;  %vm617_vm5 = vcmp.gt.s32.totalorder %v543_v19, 0  ;;  %v1887_v21 = vsel %vm614_vm2, 1.0, %v2196_v20  ;;  %s2203_s16 = smov 96   ;;  %p3040_p11 = scmp.ne.s32.totalorder %s3032_s17, 0 }
  0x41   : > { %1379 = vmatprep.subr.bf16.mxu1 %v2195_v8  ;;  %v1888_v22 = vsel %vm615_vm3, 1.0, %v2196_v20  ;;  %vm643_vm7 = vcmp.lt.s32.totalorder %v529_v17, 7  ;;  %vm644_vm8 = vcmp.lt.s32.totalorder %v536_v18, 7  ;;  %vm645_vm9 = vcmp.lt.s32.totalorder %v543_v19, 7  ;;  %v774_v51 = vld [vmem:[#allocation2] sm:$0x80] }
  0x42   : > { %1980 = vmatpush3.bf16.msra.mxu0 %v2075_v2  ;;  %v1889_v24 = vsel %vm616_vm4, 1.0, %v2196_v20  ;;  %v1890_v25 = vsel %vm617_vm5, 1.0, %v2196_v20  ;;  %v638_v26 = vpack.c.bf16 %v1888_v22, %v1887_v21  ;;  %v1895_v28 = vsel %vm642_vm6, 1.0, %v2196_v20  ;;  %v2440_v11 = vld [vmem:[#allocation2] sm:$0xf0] }
  0x43   : > { %1981 = vmatprep.subr.bf16.mxu0 %v2076_v4  ;;  %v1896_v29 = vsel %vm643_vm7, 1.0, %v2196_v20  ;;  %v1897_v30 = vsel %vm644_vm8, 1.0, %v2196_v20  ;;  %v1898_v31 = vsel %vm645_vm9, 1.0, %v2196_v20  ;;  %v2404_v32 = vpack.c.bf16 %v1890_v25, %v1889_v24  ;;  %v1024_v22 = vld [vmem:[#allocation2] sm:$0xf0] }
  0x44   : > { %v2406_v33 = vpack.c.bf16 %v1896_v29, %v1895_v28  ;;  %v667_v34 = vpack.c.bf16 %v1898_v31, %v1897_v30  ;;  %v677_v36 = vshrl.u32 %v638_v26, 16  ;;  %v680_v38 = vshll.u32 %v638_v26, 16  ;;  %v2460_v25 = vld [vmem:[%s3022_s3] ss:$0 sm:$0xff] }
  0x45   : > { %v688_v41 = vshll.u32 %v2404_v32, 16  ;;  %vm2411_vm10 = vcmp.gt.s32.totalorder %v550_v35, 0  ;;  %vm2415_vm11 = vcmp.gt.s32.totalorder %v557_v37, 0  ;;  %v685_v49 = vshrl.u32 %v2404_v32, 16 }
  0x46   : > { %1982 = vmatpush3.bf16.msra.mxu0 %v2076_v4  ;;  %v1030_v42 = vshrl.u32 %v2406_v33, 16  ;;  %v1033_v43 = vshll.u32 %v2406_v33, 16  ;;  %v1038_v44 = vshrl.u32 %v667_v34, 16  ;;  %v679_v46 = vrot.slane %v677_v36, 4 }
  0x47   : > { %v1041_v47 = vshll.u32 %v667_v34, 16  ;;  %v682_v50 = vrot.slane %v680_v38, 5  ;;  %v780_v52 = vrot.slane %v680_v38, 1  ;;  %v564_v53 = vand.u32 7, %v516_v39  ;;  %v670_v34 = vld [vmem:[#allocation2] sm:$0xf8] }
  0x48   : > { %v571_v54 = vand.u32 7, %v517_v40  ;;  %v782_v55 = vrot.slane %v688_v41, 1  ;;  %vm646_vm13 = vcmp.lt.s32.totalorder %v550_v35, 7  ;;  %vm647_vm14 = vcmp.lt.s32.totalorder %v557_v37, 7 }
  0x49   : > { %1984 = vmatmul.mubr.msk.bf16.vlgmr.msra.gmra.mrb[0].mxu0 %vm412_vm0, %v2078_v5  ;;  %v1032_v56 = vrot.slane %v1030_v42, 3  ;;  %v1035_v57 = vrot.slane %v1033_v43, 4  ;;  %v1040_v58 = vrot.slane %v1038_v44, 3  ;;  %v796_v59 = vmul.bf16 %v780_v52, %v774_v51 }
  0x4a   : > { %1987 = vmatprep.mubr.msk.bf16.mxu0 %vm412_vm0, %v2079_v6  ;;  %v1043_v60 = vrot.slane %v1041_v47, 4  ;;  %v1891_v61 = vsel %vm2411_vm10, 1.0, %v2196_v20  ;;  %v1892_v62 = vsel %vm2415_vm11, 1.0, %v2196_v20  ;;  %v1899_v63 = vsel %vm646_vm13, 1.0, %v2196_v20 }
  0x4b   : > { %v1900_v0 = vsel %vm647_vm14, 1.0, %v2196_v20  ;;  %vm621_vm2 = vcmp.gt.s32.totalorder %v571_v54, 0  ;;  %v781_v1 = vor.u32 %v780_v52, %v677_v36  ;;  %vm801_vm3 = vsmask.f32 256 }
  0x4c   : > { %v687_v2 = vrot.slane %v685_v49, 4  ;;  %v690_v3 = vrot.slane %v688_v41, 5  ;;  %v2430_v4 = vpack.c.bf16 %v1892_v62, %v1891_v61  ;;  %v2432_v5 = vrot.slane %v1038_v44, 7 }
  0x4d   : > { %vm648_vm4 = vcmp.lt.s32.totalorder %v564_v53, 7  ;;  %vm649_vm5 = vcmp.lt.s32.totalorder %v571_v54, 7  ;;  %v2434_v6 = vor.u32 %v1035_v57, %v1032_v56  ;;  %v1894_v10 = vsel %vm621_vm2, 1.0, %v2196_v20 }
  0x4e   : > { %v2442_v12 = vshrl.u32 %v796_v59, 16  ;;  %v2444_v13 = vor.u32 %v1043_v60, %v1040_v58  ;;  %vm675_vm6 = vsmask.f32 3328  ;;  %v2446_v14 = vor.u32 %v682_v50, %v679_v46  ;;  %v2083_v58 = vld [vmem:[%s3023_s4 + $0x10] sm:$0xff]  }
  0x4f   : > { %v2448_v15 = vor.u32 %v690_v3, %v687_v2  ;;  %v1140_v16 = vrot.slane %v1030_v42, 7  ;;  %v1901_v17 = vsel %vm648_vm4, 1.0, %v2196_v20  ;;  %v1902_v18 = vsel %vm649_vm5, 1.0, %v2196_v20  ;;  %1380 = vmatpush1.bf16.msra.mxu1 %v2083_v58 }
  0x50   : > { %v697_v19 = vshll.u32 %v2430_v4, 16  ;;  %v1143_v21 = vor.u32 %v2432_v5, %v1041_v47  ;;  %v694_v24 = vshrl.u32 %v2430_v4, 16  ;;  %v937_v26 = vrot.slane %v2440_v11, 4  ;;  %1381 = vmatprep.subr.bf16.mxu1 %v2195_v8 }
  0x51   : > { %1988 = vmatmul.mubr.msk.bf16.gmra.mrb[4].mxu0 %vm412_vm0, %v2080_v7  ;;  %vm620_vm0 = vcmp.gt.s32.totalorder %v564_v53, 0  ;;  %v2436_v7 = vpack.c.bf16 %v1900_v0, %v1899_v63  ;;  %v2464_v27 = vsel %vm779_vm15, %v781_v1, %v782_v55  ;;  %v805_v29 = vrot.slane %v2442_v12, 7 }
  0x52   : > { %v1893_v9 = vsel %vm620_vm0, 1.0, %v2196_v20  ;;  %v2466_v20 = vor.u32 %v782_v55, %v685_v49  ;;  %v2473_v30 = vsel %vm721_vm12, %v2434_v6, %v2444_v13  ;;  %v2475_v31 = vrot.slane %v697_v19, 1 }
  0x53   : > { %v2454_v23 = vpack.c.bf16 %v1894_v10, %v1893_v9  ;;  %v1047_v28 = vshrl.u32 %v2436_v7, 16  ;;  %v2477_v32 = vpack.c.bf16 %v1902_v18, %v1901_v17  ;;  %v2482_v36 = vsel %vm675_vm6, %v2446_v14, %v2448_v15 }
  0x54   : > { %v2486_v37 = vor.u32 %v1140_v16, %v1033_v43  ;;  %v1069_v38 = vmul.bf16 %v2434_v6, %v1024_v22  ;;  %v1050_v39 = vshll.u32 %v2436_v7, 16  ;;  %v2492_v42 = vsel %vm801_vm3, %v1140_v16, %v1143_v21  ;;  %v2084_v21 = vld [vmem:[%s3023_s4 + $0x18] sm:$0xff]  }
  0x55   : > { %v703_v44 = vshrl.u32 %v2454_v23, 16  ;;  %v696_v45 = vrot.slane %v694_v24, 4  ;;  %v1049_v48 = vrot.slane %v1047_v28, 3  ;;  %v699_v33 = vrot.slane %v697_v19, 5  ;;  %1382 = vmatpush1.bf16.msra.mxu1 %v2084_v21 }
  0x56   : > { %v716_v43 = vmul.bf16 %v2446_v14, %v670_v34  ;;  %v706_v51 = vshll.u32 %v2454_v23, 16  ;;  %v1056_v52 = vshrl.u32 %v2477_v32, 16  ;;  %v1059_v53 = vshll.u32 %v2477_v32, 16  ;;  %1383 = vmatprep.subr.bf16.mxu1 %v2195_v8 }
  0x57   : > { %v1075_v55 = vshrl.u32 %v1069_v38, 16  ;;  %v1078_v56 = vshll.u32 %v1069_v38, 16  ;;  %v1052_v57 = vrot.slane %v1050_v39, 4  ;;  %v2505_v61 = vrot.slane %v1047_v28, 7 }
  0x58   : > { %v705_v62 = vrot.slane %v703_v44, 4  ;;  %v723_v1 = vshrl.u32 %v716_v43, 16  ;;  %v726_v2 = vshll.u32 %v716_v43, 16  ;;  %v708_v4 = vrot.slane %v706_v51, 5 }
  0x59   : > { %v1058_v7 = vrot.slane %v1056_v52, 3  ;;  %v1061_v9 = vrot.slane %v1059_v53, 4  ;;  %v2512_v17 = vrot.slane %v1075_v55, 4  ;;  %v1053_v18 = vor.u32 %v1052_v57, %v1049_v48 }
  0x5a   : > { %v700_v19 = vor.u32 %v699_v33, %v696_v45  ;;  %vm936_vm7 = vcmask 1043456   ;;  %v2519_v34 = vrot.slane %v1078_v56, 5  ;;  %v787_v38 = vor.u32 %v2475_v31, %v694_v24 }
  0x5b   : > { %v788_v45 = vrot.slane %v706_v51, 1  ;;  %v786_v51 = vsel %vm779_vm15, %v2466_v20, %v2475_v31  ;;  %v2545_v57 = vsel %vm721_vm12, %v2444_v13, %v1053_v18  ;;  %v2085_v13 = vld [vmem:[%s3023_s4 + $0x20] sm:$0xff]   ;;  %vm850_vm8 = vcmask 261248  }
  0x5c   : > { %v1081_v56 = vor.u32 %v2519_v34, %v2512_v17  ;;  %v2549_v58 = vsel %vm675_vm6, %v2448_v15, %v700_v19  ;;  %1384 = vmatpush1.bf16.msra.mxu1 %v2085_v13  ;;  %vm921_vm9 = vcmask 392448   ;;  %vm958_vm10 = vcmask 523648  }
  0x5d   : > { %v2556_v31 = vsel %vm779_vm15, %v787_v38, %v788_v45  ;;  %1385 = vmatprep.subr.bf16.mxu1 %v2195_v8  ;;  %vm983_vm11 = vcmask 654848   ;;  %vm1130_vm13 = vcmask 917248   ;;  %vm1209_vm14 = vcmask 1048448  }
 0x11c   : > { %v1985_v35 = vpop.f32.mrb[0].mxu0 }
 0x11d   : > { %v468_v40 = vadd.f32 %v1985_v35, %v2460_v25  ;;  %v459_v41 = vpop.f32.mrb[1].mxu0  ;;  %v1146_v35 = vor.u32 %v2505_v61, %v1050_v39  ;;  %v2532_v39 = vor.u32 %v1061_v9, %v1058_v7 }
 0x11e   : > { %v460_v46 = vadd.f32 %v2460_v25, %v459_v41  ;;  %v1986_v47 = vpop.f32.mrb[2].mxu0 }
 0x11f   : > { %v471_v49 = vadd.f32 %v1986_v47, %v2460_v25  ;;  %v462_v50 = vpop.f32.mrb[3].mxu0  ;;  %v492_v59 = vmax.f32 %v468_v40, 0.0  ;;  %v2527_v47 = vrot.slane %v726_v2, 4  ;;  %v2553_v20 = vsel %vm801_vm3, %v2432_v5, %v1146_v35 }
 0x120   : > { %v463_v54 = vadd.f32 %v2460_v25, %v462_v50  ;;  %v490_v63 = vmax.f32 %v460_v46, 0.0  ;;  %v2525_v46 = vrot.slane %v723_v1, 3  ;;  %v2571_v5 = vsel %vm721_vm12, %v1053_v18, %v2532_v39 }
 0x121   : > { %v493_v60 = vmax.f32 %v471_v49, 0.0  ;;  %v2530_v49 = vor.u32 %v708_v4, %v705_v62 }
 0x122   : > { %v491_v0 = vmax.f32 %v463_v54, 0.0  ;;  %v2539_v54 = vrot.slane %v1056_v52, 7  ;;  %v2560_v52 = vor.u32 %v788_v45, %v703_v44 }
 0x123   : > { %v502_v3 = vpack.c.bf16 %v493_v60, %v492_v59  ;;  %v1218_v59 = vld [vmem:[#allocation2 + $0x28] sm:$0x1f]  ;;  %v2567_v62 = vsel %vm675_vm6, %v700_v19, %v2530_v49 }
 0x124   : > { %v501_v10 = vpack.c.bf16 %v491_v0, %v490_v63  ;;  %v1989_v16 = vpop.f32.mrb[4].mxu0  ;;  %v729_v63 = vor.u32 %v2527_v47, %v2525_v46  ;;  %v2578_v44 = vmul.bf16 %v1218_v59, %v2532_v39  ;;  %v1149_v2 = vor.u32 %v2539_v54, %v1059_v53  ;;  %v2087_v59 = vld [vmem:[%s3023_s4 + $0x30] sm:$0xff]  }
 0x125   : > { %506 = vst.msk [vmem:[#allocation2 + $0x10] sm:$0xff] %vm498_vm1, %v502_v3  ;;  %v484_v22 = vadd.f32 %v1989_v16, %v2460_v25  ;;  %v475_v28 = vpop.f32.mrb[5].mxu0 }
 0x126   : > { %505 = vst.msk [vmem:[#allocation2 + $0x8] sm:$0xff] %vm498_vm1, %v501_v10  ;;  %v476_v40 = vadd.f32 %v2460_v25, %v475_v28  ;;  %v1990_v41 = vpop.f32.mrb[6].mxu0 }
 0x127   : > { %v496_v48 = vmax.f32 %v484_v22, 0.0  ;;  %v487_v33 = vadd.f32 %v1990_v41, %v2460_v25  ;;  %v478_v43 = vpop.f32.mrb[7].mxu0 }
 0x128   : > { %v494_v24 = vmax.f32 %v476_v40, 0.0  ;;  %v479_v50 = vadd.f32 %v2460_v25, %v478_v43  ;;  %v859_v25 = vld [vmem:[#allocation2 + $0x28] sm:$0xf] }
 0x129   : > { %v497_v55 = vmax.f32 %v487_v33, 0.0  ;;  %v2581_v1 = vmul.bf16 %v859_v25, %v2530_v49 }
 0x12a   : > { %v495_v60 = vmax.f32 %v479_v50, 0.0 }
 0x12b   : > { %v504_v15 = vpack.c.bf16 %v497_v55, %v496_v48 }
 0x12c   : > { %v503_v0 = vpack.c.bf16 %v495_v60, %v494_v24  ;;  %v2575_v23 = vld [vmem:[#allocation2 + $0x10] sm:$0xff] }
 0x12d   : > { %508 = vst.msk [vmem:[#allocation2 + $0x20] sm:$0xff] %vm498_vm1, %v504_v15  ;;  %973 = vrot.lane.b32.xlu0 %v2575_v23, %s2197_s12  ;;  %v2589_v3 = vld [vmem:[#allocation2 + $0x8] sm:$0xff]  ;;  %v2592_v7 = vrot.slane %v2575_v23, 4  ;;  %v1220_v10 = vmul.bf16 %v2473_v30, %v2575_v23  ;;  %v798_v32 = vmul.bf16 %v2575_v23, %v786_v51  ;;  %v861_v53 = vmul.bf16 %v2575_v23, %v2482_v36 }
 0x12e   : > { %v988_v4 = vld [vmem:[#allocation2 + $0x8] sm:$0xf0]  ;;  %507 = vst.msk [vmem:[#allocation2 + $0x18] sm:$0xff] %vm498_vm1, %v503_v0  ;;  %971 = vrot.lane.b32.xlu1 %v2589_v3, %s2197_s12  ;;  %v938_v18 = vrot.slane %v2589_v3, 4  ;;  %v797_v19 = vmul.bf16 %v2589_v3, %v2464_v27 }
 0x12f   : > { %v1214_v9 = vld [vmem:[#allocation2 + $0x8] sm:$0xf0]  ;;  %v998_v16 = vrot.slane %v988_v4, 4  ;;  %v1233_v22 = vshrl.u32 %v1220_v10, 16  ;;  %v1236_v28 = vshll.u32 %v1220_v10, 16  ;;  %v815_v35 = vshrl.u32 %v798_v32, 16 }
 0x130   : > { %v1219_v21 = vmul.bf16 %v1214_v9, %v2434_v6  ;;  %v818_v38 = vshll.u32 %v798_v32, 16  ;;  %v855_v40 = vld [vmem:[#allocation2 + $0x8] sm:$0xf8]  ;;  %v939_v45 = vsel %vm936_vm7, %v937_v26, %v938_v18  ;;  %v941_v48 = vsel %vm936_vm7, %v938_v18, %v2592_v7 }
 0x131   : > { %v1000_v41 = vsel %vm936_vm7, %v998_v16, %v2592_v7  ;;  %v807_v33 = vshrl.u32 %v797_v19, 16  ;;  %v2086_v6 = vld [vmem:[%s3023_s4 + $0x28] sm:$0xff]   ;;  %v810_v27 = vshll.u32 %v797_v19, 16  ;;  %v1235_v50 = vrot.slane %v1233_v22, 4 }
 0x132   : > { %1007 = vrot.lane.b32.xlu0 %v1000_v41, %s2198_s23  ;;  %v1225_v43 = vshrl.u32 %v1219_v21, 16  ;;  %v1228_v24 = vshll.u32 %v1219_v21, 16  ;;  %946 = vrot.lane.b32.xlu1 %v939_v45, %s2199_s13  ;;  %v1238_v26 = vrot.slane %v1236_v28, 5  ;;  %v2619_v51 = vrot.slane %v815_v35, 7  ;;  %v2088_v28 = vld [vmem:[%s3023_s4 + $0x38] sm:$0xff]  }
 0x133   : > { %v809_v11 = vrot.slane %v807_v33, 7  ;;  %v860_v55 = vmul.bf16 %v855_v40, %v2446_v14  ;;  %1386 = vmatpush1.bf16.msra.mxu1 %v2086_v6  ;;  %v874_v13 = vshrl.u32 %v861_v53, 16  ;;  %v877_v15 = vshll.u32 %v861_v53, 16 }
 0x134   : > { %v1227_v25 = vrot.slane %v1225_v43, 4  ;;  %v1230_v60 = vrot.slane %v1228_v24, 5  ;;  %1387 = vmatprep.subr.bf16.mxu1 %v2195_v8  ;;  %v2626_v4 = vor.u32 %v1238_v26, %v1235_v50  ;;  %v820_v9 = vor.u32 %v818_v38, %v2619_v51 }
 0x135   : > { %v812_v0 = vor.u32 %v810_v27, %v809_v11  ;;  %v866_v10 = vshrl.u32 %v860_v55, 16  ;;  %v869_v16 = vshll.u32 %v860_v55, 16  ;;  %v876_v14 = vrot.slane %v874_v13, 3  ;;  %v2659_v33 = vld [vmem:[#allocation2 + $0x18] sm:$0xff] }
 0x136   : > { %v1231_v32 = vor.u32 %v1230_v60, %v1227_v25  ;;  %v879_v18 = vrot.slane %v877_v15, 4  ;;  %948 = vrot.lane.b32.xlu1 %v941_v48, %s2199_s13  ;;  %v1260_v53 = vshrl.u32 %v2578_v44, 16  ;;  %v2636_v22 = vsel %vm801_vm3, %v2505_v61, %v1149_v2 }
 0x137   : > { %v813_v19 = vsel %vm801_vm3, %v805_v29, %v812_v0  ;;  %v868_v21 = vrot.slane %v866_v10, 3  ;;  %1388 = vmatpush1.bf16.msra.mxu1 %v2087_v59  ;;  %v871_v35 = vrot.slane %v869_v16, 4  ;;  %v1156_v29 = vmul.bf16 %v2486_v37, %v2589_v3 }
 0x138   : > { %838 = vrot.lane.b32.xlu0 %v813_v19, %s2200_s10  ;;  %v2642_v38 = vor.u32 %v879_v18, %v876_v14  ;;  %v1240_v12 = vsel %vm675_vm6, %v1231_v32, %v2626_v4  ;;  %1389 = vmatprep.subr.bf16.mxu1 %v2195_v8  ;;  %v2652_v61 = vmul.bf16 %v2492_v42, %v2575_v23  ;;  %v1263_v40 = vshll.u32 %v2578_v44, 16  ;;  %v2089_v44 = vld [vmem:[%s3023_s4 + $0x40] sm:$0xff]  }
 0x139   : > { %1272 = vst.msk [vmem:[#allocation3 + $0x8] sm:$0xff] %vm498_vm1, %v1240_v12  ;;  %v1070_v2 = vmul.bf16 %v2473_v30, %v2589_v3  ;;  %v901_v41 = vshrl.u32 %v2581_v1, 16  ;;  %v821_v45 = vsel %vm801_vm3, %v809_v11, %v820_v9  ;;  %v872_v48 = vor.u32 %v871_v35, %v868_v21  ;;  %v2689_v18 = vld [vmem:[#allocation2 + $0x20] sm:$0xff] }
 0x13a   : > { %v1164_v37 = vshll.u32 %v1156_v29, 16  ;;  %v1071_v6 = vmul.bf16 %v2545_v57, %v2575_v23  ;;  %840 = vrot.lane.b32.xlu1 %v821_v45, %s2200_s10  ;;  %v1162_v42 = vshrl.u32 %v1156_v29, 16  ;;  %v1169_v27 = vshll.u32 %v2652_v61, 16 }
 0x13b   : > { %v1083_v43 = vshrl.u32 %v1070_v2, 16  ;;  %v904_v30 = vshll.u32 %v2581_v1, 16  ;;  %1390 = vmatpush1.bf16.msra.mxu1 %v2088_v28  ;;  %v881_v24 = vsel %vm721_vm12, %v872_v48, %v2642_v38  ;;  %v1086_v11 = vshll.u32 %v1070_v2, 16 }
 0x13c   : > { %v1166_v50 = vrot.slane %v1164_v37, 1  ;;  %v1092_v26 = vshrl.u32 %v1071_v6, 16  ;;  %1391 = vmatprep.subr.bf16.mxu1 %v2195_v8  ;;  %909 = vrot.lane.b32.xlu0 %v881_v24, %s2201_s15  ;;  %v2675_v55 = vmul.bf16 %v2589_v3, %v2482_v36  ;;  %v1095_v25 = vshll.u32 %v1071_v6, 16 }
 0x13d   : > { %v1085_v59 = vrot.slane %v1083_v43, 4  ;;  %v1221_v60 = vmul.bf16 %v2545_v57, %v2659_v33  ;;  %v1171_v15 = vrot.slane %v1169_v27, 1  ;;  %v1088_v0 = vrot.slane %v1086_v11, 5 }
 0x13e   : > { %v1167_v13 = vor.u32 %v1166_v50, %v1162_v42  ;;  %v1094_v9 = vrot.slane %v1092_v26, 4  ;;  %975 = vrot.lane.b32.xlu1 %v2659_v33, %s2197_s12  ;;  %v1097_v8 = vrot.slane %v1095_v25, 5  ;;  %v2683_v16 = vmul.bf16 %v2553_v20, %v2659_v33 }
 0x13f   : > { %v1242_v10 = vshrl.u32 %v1221_v60, 16  ;;  %v1245_v32 = vshll.u32 %v1221_v60, 16  ;;  %1392 = vmatpush1.bf16.msra.mxu1 %v2089_v44  ;;  %v1089_v14 = vor.u32 %v1088_v0, %v1085_v59  ;;  %v2687_v57 = vrot.slane %v2659_v33, 4 }
 0x140   : > { %v1277_v36 = vld [vmem:[#allocation3 + $0x8] sm:$0xff]  ;;  %v1172_v3 = vsel %vm779_vm15, %v1167_v13, %v1171_v15  ;;  %v2691_v19 = vrot.slane %v1260_v53, 4  ;;  %v2695_v21 = vor.u32 %v1097_v8, %v1094_v9  ;;  %v1177_v35 = vshll.u32 %v2683_v16, 16 }
 0x141   : > { %1913 = vmatprep.mubr.msk.bf16.mxu1 %vm498_vm1, %v1277_v36  ;;  %1197 = vrot.lane.b32.xlu0 %v1172_v3, %s2202_s21  ;;  %v1244_v20 = vrot.slane %v1242_v10, 4  ;;  %v1247_v28 = vrot.slane %v1245_v32, 5  ;;  %v731_v12 = vshrl.u32 %v2675_v55, 16  ;;  %v1090_v29 = vsel %vm675_vm6, %v1081_v56, %v1089_v14 }
 0x142   : > { %v2703_v53 = vrot.slane %v1263_v40, 5  ;;  %v2705_v2 = vrot.slane %v901_v41, 3  ;;  %v734_v45 = vshll.u32 %v2675_v55, 16  ;;  %1118 = vrot.lane.b32.xlu1 %v1090_v29, %s2203_s16  ;;  %v799_v37 = vmul.bf16 %v2659_v33, %v2556_v31 }
 0x143   : > { %v2709_v48 = vor.u32 %v1247_v28, %v1244_v20  ;;  %v800_v6 = vmul.bf16 %v2689_v18, %v2560_v52  ;;  %v1099_v17 = vsel %vm675_vm6, %v1089_v14, %v2695_v21  ;;  %v1173_v34 = vshrl.u32 %v2652_v61, 16 }
 0x144   : > { %v2718_v56 = vrot.slane %v1177_v35, 1  ;;  %v862_v40 = vmul.bf16 %v2659_v33, %v2549_v58  ;;  %v1002_v31 = vsel %vm936_vm7, %v2592_v7, %v2687_v57  ;;  %v718_v42 = vmul.bf16 %v2575_v23, %v2549_v58  ;;  %v1139_v35 = vld [vmem:[#allocation2 + $0x28] sm:$0x1] }
 0x145   : > { %v1249_v41 = vsel %vm675_vm6, %v2626_v4, %v2709_v48  ;;  %1120 = vrot.lane.b32.xlu0 %v1099_v17, %s2203_s16  ;;  %v831_v52 = vshrl.u32 %v800_v6, 16  ;;  %v1175_v61 = vor.u32 %v1173_v34, %v1171_v15  ;;  %v1003_v27 = vrot.slane %v2689_v18, 4 }
 0x146   : > { %1273 = vst.msk [vmem:[#allocation3 + $0x18] sm:$0xff] %vm498_vm1, %v1249_v41  ;;  %v834_v43 = vshll.u32 %v800_v6, 16  ;;  %v883_v44 = vshrl.u32 %v862_v40, 16  ;;  %1009 = vrot.lane.b32.xlu1 %v1002_v31, %s2198_s23  ;;  %v823_v4 = vshrl.u32 %v799_v37, 16  ;;  %v886_v50 = vshll.u32 %v862_v40, 16 }
 0x147   : > { %v833_v24 = vrot.slane %v831_v52, 7  ;;  %v863_v11 = vmul.bf16 %v2689_v18, %v2567_v62  ;;  %v733_v7 = vrot.slane %v731_v12, 3  ;;  %v1180_v26 = vsel %vm779_vm15, %v1175_v61, %v2718_v56 }
 0x148   : > { %v885_v58 = vrot.slane %v883_v44, 3  ;;  %v2740_v23 = vrot.slane %v904_v30, 4  ;;  %v740_v55 = vshrl.u32 %v718_v42, 16  ;;  %v743_v59 = vshll.u32 %v718_v42, 16 }
 0x149   : > { %950 = vrot.lane.b32.xlu0 %v1002_v31, %s2199_s13  ;;  %v888_v25 = vrot.slane %v886_v50, 4  ;;  %v719_v60 = vmul.bf16 %v2659_v33, %v2567_v62  ;;  %v836_v13 = vor.u32 %v834_v43, %v833_v24  ;;  %v892_v15 = vshrl.u32 %v863_v11, 16  ;;  %v1028_v24 = vld [vmem:[#allocation2 + $0x20] sm:$0x1f] }
 0x14a   : > { %v895_v0 = vshll.u32 %v863_v11, 16  ;;  %v1072_v9 = vmul.bf16 %v2571_v5, %v2659_v33  ;;  %v736_v8 = vrot.slane %v734_v45, 4  ;;  %1199 = vrot.lane.b32.xlu1 %v1180_v26, %s2202_s21  ;;  %v1004_v1 = vsel %vm936_vm7, %v2687_v57, %v1003_v27 }
 0x14b   : > { %v825_v30 = vrot.slane %v823_v4, 7  ;;  %v826_v10 = vshll.u32 %v799_v37, 16  ;;  %v889_v32 = vor.u32 %v888_v25, %v885_v58  ;;  %v894_v36 = vrot.slane %v892_v15, 3  ;;  %v930_v4 = vld [vmem:[#allocation2 + $0x20] sm:$0xf] }
 0x14c   : > { %v897_v3 = vrot.slane %v895_v0, 4  ;;  %v1101_v62 = vshrl.u32 %v1072_v9, 16  ;;  %v742_v14 = vrot.slane %v740_v55, 3  ;;  %v745_v20 = vrot.slane %v743_v59, 4 }
 0x14d   : > { %1011 = vrot.lane.b32.xlu0 %v1004_v1, %s2198_s23  ;;  %v1104_v28 = vshll.u32 %v1072_v9, 16  ;;  %v1222_v33 = vmul.bf16 %v2571_v5, %v2689_v18  ;;  %v837_v12 = vsel %vm801_vm3, %v825_v30, %v836_v13  ;;  %v749_v29 = vshrl.u32 %v719_v60, 16 }
 0x14e   : > { %v898_v45 = vor.u32 %v897_v3, %v894_v36  ;;  %v1103_v6 = vrot.slane %v1101_v62, 4  ;;  %844 = vrot.lane.b32.xlu1 %v837_v12, %s2200_s10  ;;  %v752_v37 = vshll.u32 %v719_v60, 16  ;;  %v890_v41 = vsel %vm721_vm12, %v2642_v38, %v889_v32  ;;  %v674_v60 = vld [vmem:[#allocation2 + $0x20] sm:$0xf] }
 0x14f   : > { %v1106_v17 = vrot.slane %v1104_v28, 5  ;;  %v1251_v34 = vshrl.u32 %v1222_v33, 16  ;;  %v1254_v40 = vshll.u32 %v1222_v33, 16  ;;  %v828_v31 = vor.u32 %v826_v10, %v825_v30 }
 0x150   : > { %v1159_v52 = vmul.bf16 %v2636_v22, %v2689_v18  ;;  %v1160_v5 = vmul.bf16 %v2539_v54, %v1139_v35  ;;  %v1266_v43 = vor.u32 %v2703_v53, %v2691_v19  ;;  %v907_v44 = vor.u32 %v2740_v23, %v2705_v2 }
 0x151   : > { %911 = vrot.lane.b32.xlu0 %v890_v41, %s2201_s15  ;;  %v1253_v42 = vrot.slane %v1251_v34, 4  ;;  %v1256_v61 = vrot.slane %v1254_v40, 5  ;;  %v751_v50 = vrot.slane %v749_v29, 3  ;;  %v899_v38 = vsel %vm721_vm12, %v889_v32, %v898_v45 }
 0x152   : > { %v1107_v11 = vor.u32 %v1106_v17, %v1103_v6  ;;  %v737_v26 = vor.u32 %v736_v8, %v733_v7  ;;  %v754_v22 = vrot.slane %v752_v37, 4  ;;  %913 = vrot.lane.b32.xlu1 %v899_v38, %s2201_s15  ;;  %v1181_v58 = vshrl.u32 %v2683_v16, 16 }
 0x153   : > { %v1257_v54 = vor.u32 %v1256_v61, %v1253_v42  ;;  %v746_v55 = vor.u32 %v745_v20, %v742_v14  ;;  %v829_v19 = vsel %vm801_vm3, %v2619_v51, %v828_v31  ;;  %v944_v53 = vrot.slane %v930_v4, 4 }
 0x154   : > { %v1185_v59 = vshll.u32 %v1159_v52, 16  ;;  %v1073_v2 = vmul.bf16 %v2532_v39, %v1028_v24  ;;  %v738_v16 = vsel %vm721_vm12, %v729_v63, %v737_v26  ;;  %v1108_v51 = vsel %vm675_vm6, %v2695_v21, %v1107_v11  ;;  %v992_v39 = vld [vmem:[#allocation2 + $0x28] sm:$0xf] }
 0x155   : > { %842 = vrot.lane.b32.xlu0 %v829_v19, %s2200_s10  ;;  %v1258_v23 = vsel %vm675_vm6, %v2709_v48, %v1257_v54  ;;  %v1267_v7 = vsel %vm675_vm6, %v1257_v54, %v1266_v43  ;;  %v747_v25 = vsel %vm721_vm12, %v737_v26, %v746_v55  ;;  %770 = vst.msk [vmem:[#allocation3] sm:$0xff] %vm498_vm1, %v738_v16  ;;  %v1005_v9 = vrot.slane %v992_v39, 4  ;;  %v1279_v24 = vld [vmem:[#allocation3 + $0x18] sm:$0xff] }
 0x156   : > { %1274 = vst.msk [vmem:[#allocation3 + $0x28] sm:$0xff] %vm498_vm1, %v1258_v23  ;;  %1275 = vst.msk [vmem:[#allocation3 + $0x38] sm:$0xff] %vm498_vm1, %v1267_v7  ;;  %1122 = vrot.lane.b32.xlu1 %v1108_v51, %s2203_s16  ;;  %v908_v46 = vsel %vm721_vm12, %v898_v45, %v907_v44  ;;  %v1183_v47 = vor.u32 %v1181_v58, %v2718_v56  ;;  %v1110_v63 = vshrl.u32 %v1073_v2, 16  ;;  %v1113_v48 = vshll.u32 %v1073_v2, 16  ;;  %v2090_v51 = vld [vmem:[%s3025_s6] sm:$0xff]   ;;  %v2091_v39 = vld [vmem:[%s3025_s6 + $0x8] sm:$0xff]  }
 0x157   : > { %771 = vst.msk [vmem:[#allocation3 + $0x10] sm:$0xff] %vm498_vm1, %v747_v25  ;;  %v720_v13 = vmul.bf16 %v2530_v49, %v674_v60  ;;  %v755_v21 = vor.u32 %v754_v22, %v751_v50  ;;  %v945_v15 = vsel %vm936_vm7, %v2687_v57, %v944_v53  ;;  %v1187_v0 = vrot.slane %v1185_v59, 1  ;;  %1991 = vmatprep.subr.bf16.mxu0 %v2090_v51 }
 0x158   : > { %v1193_v8 = vshll.u32 %v1160_v5, 16  ;;  %v1189_v1 = vshrl.u32 %v1159_v52, 16  ;;  %v1112_v49 = vrot.slane %v1110_v63, 4  ;;  %v1115_v36 = vrot.slane %v1113_v48, 5  ;;  %1992 = vmatpush3.bf16.msra.mxu0 %v2090_v51 }
 0x159   : > { %915 = vrot.lane.b32.xlu0 %v908_v46, %s2201_s15  ;;  %v758_v30 = vshrl.u32 %v720_v13, 16  ;;  %v761_v10 = vshll.u32 %v720_v13, 16  ;;  %v756_v32 = vsel %vm721_vm12, %v746_v55, %v755_v21  ;;  %v1188_v56 = vsel %vm779_vm15, %v1183_v47, %v1187_v0  ;;  %1993 = vmatprep.subr.bf16.mxu0 %v2091_v39  ;;  %v2092_v46 = vld [vmem:[%s3025_s6] sm:$0xff]  }
 0x15a   : > { %952 = vrot.lane.b32.xlu1 %v945_v15, %s2199_s13  ;;  %772 = vst.msk [vmem:[#allocation3 + $0x20] sm:$0xff] %vm498_vm1, %v756_v32  ;;  %v1006_v57 = vsel %vm936_vm7, %v1003_v27, %v1005_v9  ;;  %v1191_v14 = vor.u32 %v1189_v1, %v1187_v0  ;;  %v1195_v20 = vrot.slane %v1193_v8, 1  ;;  %v1116_v33 = vor.u32 %v1115_v36, %v1112_v49  ;;  %v1903_v47 = vld [vmem:[%s3024_s5] ss:$0 sm:$0xff] }
 0x15b   : > { %v760_v3 = vrot.slane %v758_v30, 3  ;;  %v763_v62 = vrot.slane %v761_v10, 4 }
 0x15c   : > { %v1196_v12 = vsel %vm779_vm15, %v1191_v14, %v1195_v20  ;;  %v1117_v29 = vsel %vm675_vm6, %v1107_v11, %v1116_v33  ;;  %1994 = vmatpush3.bf16.msra.mxu0 %v2091_v39  ;;  %v2093_v14 = vld [vmem:[%s3025_s6 + $0x8] sm:$0xff]   ;;  %vm1593_vm15 = vcmask 519168  }
 0x15d   : > { %1201 = vrot.lane.b32.xlu0 %v1188_v56, %s2202_s21  ;;  %v764_v28 = vor.u32 %v763_v62, %v760_v3  ;;  %v1281_v53 = vld [vmem:[#allocation3 + $0x28] sm:$0xff]  ;;  %v1283_v25 = vld [vmem:[#allocation3 + $0x38] sm:$0xff]  ;;  %2003 = vmatprep.subr.bf16.mxu0 %v2092_v46 }
 0x15e   : > { %1013 = vrot.lane.b32.xlu1 %v1006_v57, %s2198_s23  ;;  %s2204_s23 = smov [#allocation7]  }
 0x15f   : > { %v765_v35 = vsel %vm721_vm12, %v755_v21, %v764_v28  ;;  %vm1019_vm12 = vcmask 786048   ;;  %s2128_s13 = sshll.u32 %s2204_s23, 4  ;;  %s2129_s13 = int_to_ptr.vmem [resolvable:$false] %s2128_s13 }
 0x160   : > { %773 = vst.msk [vmem:[#allocation3 + $0x30] sm:$0xff] %vm498_vm1, %v765_v35  ;;  %s2130_s19 = scalar_lea.vmem %s2129_s13, 2048 }
 0x161   : > { %977 = vrot.lane.b32.xlu0 %v2689_v18, %s2197_s12 }
 0x162   : > { %1203 = vrot.lane.b32.xlu1 %v1196_v12, %s2202_s21 }
 0x165   : > { %1124 = vrot.lane.b32.xlu0 %v1117_v29, %s2203_s16 }
 0x19f   : > { %v974_v27 = vpop.permute.xlu0 %973 }
 0x1a0   : > { %v972_v45 = vpop.permute.xlu1 %971 }
 0x1a4   : > { %v947_v6 = vpop.permute.xlu1 %946  ;;  %v1008_v37 = vpop.permute.xlu0 %1007 }
 0x1a8   : > { %v949_v17 = vpop.permute.xlu1 %948 }
 0x1aa   : > { %v839_v34 = vpop.permute.xlu0 %838 }
 0x1ab   : > { %851 = vst.msk [vmem:[#allocation3] sm:$0xff] %vm850_vm8, %v839_v34 }
 0x1ac   : > { %v841_v18 = vpop.permute.xlu1 %840 }
 0x1ad   : > { %852 = vst.msk [vmem:[#allocation3 + $0x10] sm:$0xff] %vm850_vm8, %v841_v18 }
 0x1ae   : > { %v910_v40 = vpop.permute.xlu0 %909 }
 0x1af   : > { %922 = vst.msk [vmem:[#allocation3] sm:$0xff] %vm921_vm9, %v910_v40 }
 0x1b0   : > { %959 = vst.msk [vmem:[#allocation3] sm:$0xff] %vm958_vm10, %v947_v6  ;;  %v976_v41 = vpop.permute.xlu1 %975 }
 0x1b1   : > { %984 = vst.msk [vmem:[#allocation3] sm:$0xff] %vm983_vm11, %v972_v45 }
 0x1b2   : > { %1020 = vst.msk [vmem:[#allocation3] sm:$0xff] %vm1019_vm12, %v1008_v37 }
 0x1b3   : > { %v1198_v31 = vpop.permute.xlu0 %1197 }
 0x1b4   : > { %v1119_v52 = vpop.permute.xlu1 %1118 }
 0x1b5   : > { %1131 = vst.msk [vmem:[#allocation3] sm:$0xff] %vm1130_vm13, %v1119_v52 }
 0x1b6   : > { %1210 = vst.msk [vmem:[#allocation3] sm:$0xff] %vm1209_vm14, %v1198_v31 }
 0x1b7   : > { %v1121_v5 = vpop.permute.xlu0 %1120 }
 0x1b8   : > { %v1010_v42 = vpop.permute.xlu1 %1009 }
 0x1bb   : > { %v951_v61 = vpop.permute.xlu0 %950 }
 0x1bc   : > { %v1200_v43 = vpop.permute.xlu1 %1199 }
 0x1bd   : > { %v1276_v44 = vld [vmem:[#allocation3] sm:$0xff] }
 0x1be   : > { %1408 = vmatmul.mubr.bf16.vlgmr.msra.gmra.mrb[0].mxu1 %v1276_v44 }
 0x1bf   : > { %v1012_v4 = vpop.permute.xlu0 %1011  ;;  %1914 = vmatprep.mubr.msk.bf16.mxu1 %vm498_vm1, %v1279_v24  ;;  %v2876_v24 = vld [vmem:[%s2360_s25 + $0x10] sm:$0xff]  }
 0x1c0   : > { %v845_v50 = vpop.permute.xlu1 %844 }
 0x1c1   : > { %854 = vst.msk [vmem:[#allocation3 + $0x30] sm:$0xff] %vm850_vm8, %v845_v50  ;;  %v2879_v50 = vld [vmem:[%s2360_s25] sm:$0xff]  }
 0x1c3   : > { %v912_v38 = vpop.permute.xlu0 %911 }
 0x1c4   : > { %923 = vst.msk [vmem:[#allocation3 + $0x10] sm:$0xff] %vm921_vm9, %v912_v38  ;;  %v914_v11 = vpop.permute.xlu1 %913 }
 0x1c5   : > { %960 = vst.msk [vmem:[#allocation3 + $0x10] sm:$0xff] %vm958_vm10, %v949_v17 }
 0x1c6   : > { %985 = vst.msk [vmem:[#allocation3 + $0x10] sm:$0xff] %vm983_vm11, %v974_v27 }
 0x1c7   : > { %1021 = vst.msk [vmem:[#allocation3 + $0x10] sm:$0xff] %vm1019_vm12, %v1010_v42  ;;  %v843_v26 = vpop.permute.xlu0 %842 }
 0x1c8   : > { %1132 = vst.msk [vmem:[#allocation3 + $0x10] sm:$0xff] %vm1130_vm13, %v1121_v5  ;;  %v1123_v22 = vpop.permute.xlu1 %1122 }
 0x1c9   : > { %853 = vst.msk [vmem:[#allocation3 + $0x20] sm:$0xff] %vm850_vm8, %v843_v26 }
 0x1ca   : > { %1211 = vst.msk [vmem:[#allocation3 + $0x10] sm:$0xff] %vm1209_vm14, %v1200_v43 }
 0x1cb   : > { %924 = vst.msk [vmem:[#allocation3 + $0x20] sm:$0xff] %vm921_vm9, %v914_v11  ;;  %v916_v54 = vpop.permute.xlu0 %915  ;;  %v2882_v11 = vld [vmem:[%s2360_s25 + $0x18] sm:$0xff]  }
 0x1cc   : > { %961 = vst.msk [vmem:[#allocation3 + $0x20] sm:$0xff] %vm958_vm10, %v951_v61  ;;  %v953_v58 = vpop.permute.xlu1 %952 }
 0x1cd   : > { %986 = vst.msk [vmem:[#allocation3 + $0x20] sm:$0xff] %vm983_vm11, %v976_v41 }
 0x1ce   : > { %1022 = vst.msk [vmem:[#allocation3 + $0x20] sm:$0xff] %vm1019_vm12, %v1012_v4  ;;  %v2873_v4 = vld [vmem:[%s3026_s7] ss:$0 sm:$0xff] }
 0x1cf   : > { %925 = vst.msk [vmem:[#allocation3 + $0x30] sm:$0xff] %vm921_vm9, %v916_v54  ;;  %v1202_v55 = vpop.permute.xlu0 %1201 }
 0x1d0   : > { %1133 = vst.msk [vmem:[#allocation3 + $0x20] sm:$0xff] %vm1130_vm13, %v1123_v22  ;;  %v1014_v59 = vpop.permute.xlu1 %1013  ;;  %v1571_v22 = vunpack.c.l.bf16 %v2876_v24 }
 0x1d1   : > { %962 = vst.msk [vmem:[#allocation3 + $0x30] sm:$0xff] %vm958_vm10, %v953_v58  ;;  %v1278_v19 = vld [vmem:[#allocation3 + $0x10] sm:$0xff]  ;;  %v2887_v58 = vld [vmem:[%s2360_s25 + $0x8] sm:$0xff]  }
 0x1d2   : > { %1212 = vst.msk [vmem:[#allocation3 + $0x20] sm:$0xff] %vm1209_vm14, %v1202_v55  ;;  %1416 = vmatmul.mubr.bf16.gmra.mrb[4].mxu1 %v1278_v19  ;;  %v1569_v19 = vunpack.c.l.bf16 %v2879_v50 }
 0x1d3   : > { %1915 = vmatprep.mubr.msk.bf16.mxu1 %vm498_vm1, %v1281_v53  ;;  %v978_v2 = vpop.permute.xlu0 %977 }
 0x1d4   : > { %987 = vst.msk [vmem:[#allocation3 + $0x30] sm:$0xff] %vm983_vm11, %v978_v2  ;;  %v1204_v16 = vpop.permute.xlu1 %1203 }
 0x1d5   : > { %1023 = vst.msk [vmem:[#allocation3 + $0x30] sm:$0xff] %vm1019_vm12, %v1014_v59 }
 0x1d7   : > { %v1125_v23 = vpop.permute.xlu0 %1124 }
 0x1d8   : > { %1134 = vst.msk [vmem:[#allocation3 + $0x30] sm:$0xff] %vm1130_vm13, %v1125_v23  ;;  %v1572_v23 = vunpack.c.l.bf16 %v2882_v11 }
 0x1d9   : > { %v1280_v7 = vld [vmem:[#allocation3 + $0x20] sm:$0xff]  ;;  %1213 = vst.msk [vmem:[#allocation3 + $0x30] sm:$0xff] %vm1209_vm14, %v1204_v16 }
 0x1da   : > { %1424 = vmatmul.mubr.bf16.gmra.mrb[8].mxu1 %v1280_v7 }
 0x1db   : > { %1916 = vmatprep.mubr.msk.bf16.mxu1 %vm498_vm1, %v1283_v25  ;;  %vm1475_vm1 = vcmask 261120  }
 0x1e0   : > { %v1282_v60 = vld [vmem:[#allocation3 + $0x30] sm:$0xff] }
 0x1e2   : > { %1432 = vmatmul.mubr.bf16.gmra.mrb[12].mxu1 %v1282_v60  ;;  %v1570_v60 = vunpack.c.l.bf16 %v2887_v58 }
 0x291   : > { %v1409_v63 = vpop.f32.mrb[0].mxu1 }
 0x292   : > { %v1410_v48 = vadd.f32 %v1903_v47, %v1409_v63  ;;  %v1411_v13 = vpop.f32.mrb[1].mxu1 }
 0x293   : > { %v1412_v21 = vpop.f32.mrb[2].mxu1 }
 0x294   : > { %v1413_v15 = vadd.f32 %v1903_v47, %v1412_v21  ;;  %v1414_v0 = vpop.f32.mrb[3].mxu1  ;;  %v1440_v9 = vmax.f32 %v1410_v48, 0.0 }
 0x296   : > { %v1441_v8 = vmax.f32 %v1413_v15, 0.0 }
 0x298   : > { %v1448_v1 = vpack.c.bf16 %v1441_v8, %v1440_v9  ;;  %v2908_v9 = vld [vmem:[%s2360_s25 + $0x30] sm:$0xff]   ;;  %v2911_v8 = vld [vmem:[%s2360_s25 + $0x20] sm:$0xff]  }
 0x29a   : > { %1617 = vrot.lane.b32.xlu0 %v1448_v1, %s2203_s16  ;;  %1995 = vmatprep.mubr.msk.bf16.mxu0 %vm1475_vm1, %v1448_v1 }
 0x2a5   : > { %v1417_v30 = vpop.f32.mrb[4].mxu1 }
 0x2a6   : > { %v1418_v10 = vadd.f32 %v1903_v47, %v1417_v30  ;;  %v1419_v32 = vpop.f32.mrb[5].mxu1  ;;  %v2914_v30 = vld [vmem:[%s2360_s25 + $0x38] sm:$0xff]  }
 0x2a7   : > { %v1420_v56 = vpop.f32.mrb[6].mxu1  ;;  %v1575_v32 = vunpack.c.l.bf16 %v2908_v9 }
 0x2a8   : > { %v1421_v49 = vadd.f32 %v1903_v47, %v1420_v56  ;;  %v1422_v36 = vpop.f32.mrb[7].mxu1  ;;  %v1442_v3 = vmax.f32 %v1418_v10, 0.0 }
 0x2aa   : > { %v1443_v62 = vmax.f32 %v1421_v49, 0.0  ;;  %v2919_v49 = vld [vmem:[%s2360_s25 + $0x28] sm:$0xff]   ;;  %s1954_s25 = sshll.u32 %s2272_s9, 10  ;;  %s1765_s9 = scalar_lea.sflag [#allocation6], %s2354_s22 }
 0x2ab   : > { %s2966_s15 = scalar_lea.hbm %s3027_s8, %s1954_s25 }
 0x2ac   : > { %v1449_v57 = vpack.c.bf16 %v1443_v62, %v1442_v3  ;;  %v1573_v3 = vunpack.c.l.bf16 %v2911_v8 }
 0x2ad   : > { %v1425_v20 = vpop.f32.mrb[8].mxu1 }
 0x2ae   : > { %v1426_v28 = vadd.f32 %v1903_v47, %v1425_v20  ;;  %v1427_v33 = vpop.f32.mrb[9].mxu1  ;;  %1619 = vrot.lane.b32.xlu1 %v1449_v57, %s2203_s16  ;;  %1996 = vmatmul.mubr.msk.bf16.vlgmr.msra.gmra.mrb[8].mxu0 %vm1475_vm1, %v1449_v57  ;;  %v1576_v20 = vunpack.c.l.bf16 %v2914_v30 }
 0x2af   : > { %v1428_v35 = vpop.f32.mrb[10].mxu1  ;;  %2004 = vmatpush3.bf16.msra.mxu0 %v2092_v46 }
 0x2b0   : > { %v1429_v12 = vadd.f32 %v1903_v47, %v1428_v35  ;;  %v1430_v29 = vpop.f32.mrb[11].mxu1  ;;  %2005 = vmatprep.subr.bf16.mxu0 %v2093_v14  ;;  %v1444_v27 = vmax.f32 %v1426_v28, 0.0 }
 0x2b2   : > { %v1445_v45 = vmax.f32 %v1429_v12, 0.0  ;;  %v1574_v12 = vunpack.c.l.bf16 %v2919_v49 }
 0x2b3   : > { %2006 = vmatpush3.bf16.msra.mxu0 %v2093_v14 }
 0x2b4   : > { %v1450_v6 = vpack.c.bf16 %v1445_v45, %v1444_v27 }
 0x2b5   : > { %v1433_v37 = vpop.f32.mrb[12].mxu1 }
 0x2b6   : > { %v1434_v17 = vadd.f32 %v1903_v47, %v1433_v37  ;;  %v1435_v34 = vpop.f32.mrb[13].mxu1  ;;  %1621 = vrot.lane.b32.xlu0 %v1450_v6, %s2203_s16  ;;  %1999 = vmatprep.mubr.msk.bf16.mxu0 %vm1475_vm1, %v1450_v6 }
 0x2b7   : > { %v1436_v18 = vpop.f32.mrb[14].mxu1 }
 0x2b8   : > { %v1437_v40 = vadd.f32 %v1903_v47, %v1436_v18  ;;  %v1438_v41 = vpop.f32.mrb[15].mxu1  ;;  %v1446_v31 = vmax.f32 %v1434_v17, 0.0 }
 0x2ba   : > { %v1447_v52 = vmax.f32 %v1437_v40, 0.0 }
 0x2bc   : > { %v1451_v5 = vpack.c.bf16 %v1447_v52, %v1446_v31 }
 0x2be   : > { %1623 = vrot.lane.b32.xlu1 %v1451_v5, %s2203_s16  ;;  %2000 = vmatmul.mubr.msk.bf16.gmra.mrb[12].mxu0 %vm1475_vm1, %v1451_v5  ;;  %s3039_s16 = sshll.u32 %s2354_s22, 6  ;;  %v1733_v5 = vunpack.c.h.bf16 %v2876_v24  ;;  %v1732_v24 = vunpack.c.h.bf16 %v2887_v58 }
 0x2bf   : > { %s2897_s24 = scalar_lea.vmem [#allocation7], %s3039_s16 }
 0x2c0   : > { %s1778_s10 = sshll.u32 %s2897_s24, 4  ;;  %s2970_s10 = int_to_ptr.vmem [resolvable:$true] %s1778_s10 }
 0x2c1   : > { %s2124_s21 = scalar_lea.vmem %s2970_s10, 1024  ;;  %p2131_p9 = scmp.lt.s32.totalorder %s2970_s10, %s2129_s13 }
 0x2c2   : > { %p2125_p6 = scmp.ne.s32.totalorder %s2970_s10, %s2124_s21  ;;  %p2132_p13 = scmp.lt.s32.totalorder %s2130_s19, %s2124_s21 }
 0x2c4   : > { %p2126_p12 = pnand %p2125_p6, %p3040_p11  ;;  %p2133_p1 = por %p2132_p13, %p2131_p9 }
 0x2c6   : > { %p2127_p8 = pneg %p2126_p12 }
 0x2c8   : > { %p2134_p3 = pnand %p2133_p1, %p2127_p8 }
 0x30c   : > { %v1618_v42 = vpop.permute.xlu0 %1617 }
 0x30d   : > { %2007 = vmatprep.mubr.msk.bf16.mxu0 %vm1475_vm1, %v1618_v42 }
 0x320   : > { %v1620_v61 = vpop.permute.xlu1 %1619 }
 0x321   : > { %2008 = vmatmul.mubr.msk.bf16.vlgmr.msra.gmra.mrb[16].mxu0 %vm1475_vm1, %v1620_v61 }
 0x328   : > { %v1622_v43 = vpop.permute.xlu0 %1621 }
 0x329   : > { %2011 = vmatprep.mubr.msk.bf16.mxu0 %vm1475_vm1, %v1622_v43  ;;  %v1731_v43 = vunpack.c.h.bf16 %v2879_v50 }
 0x330   : > { %v1624_v44 = vpop.permute.xlu1 %1623 }
 0x331   : > { %2012 = vmatmul.mubr.msk.bf16.gmra.mrb[20].mxu0 %vm1475_vm1, %v1624_v44 }
 0x381   : > { %v1997_v38 = vpop.f32.mrb[8].mxu0 }
 0x382   : > { %v1531_v26 = vadd.f32 %v1997_v38, %v2873_v4  ;;  %v1522_v54 = vpop.f32.mrb[9].mxu0 }
 0x383   : > { %v1523_v55 = vadd.f32 %v2873_v4, %v1522_v54  ;;  %v1998_v53 = vpop.f32.mrb[10].mxu0 }
 0x384   : > { %v1555_v59 = vmax.f32 %v1531_v26, 0.0  ;;  %v1534_v2 = vadd.f32 %v1998_v53, %v2873_v4  ;;  %v1525_v7 = vpop.f32.mrb[11].mxu0 }
 0x385   : > { %v1553_v16 = vmax.f32 %v1523_v55, 0.0  ;;  %v1526_v25 = vadd.f32 %v2873_v4, %v1525_v7 }
 0x386   : > { %v1579_v51 = vadd.f32 %v1571_v22, %v1555_v59  ;;  %v1556_v39 = vmax.f32 %v1534_v2, 0.0  ;;  %v1734_v22 = vunpack.c.h.bf16 %v2882_v11 }
 0x387   : > { %v1577_v46 = vadd.f32 %v1569_v19, %v1553_v16  ;;  %v1554_v47 = vmax.f32 %v1526_v25, 0.0 }
 0x388   : > { %v1587_v63 = vpack.c.bf16 %v1579_v51, %v1579_v51  ;;  %v1580_v48 = vadd.f32 %v1572_v23, %v1556_v39  ;;  %v1737_v39 = vunpack.c.h.bf16 %v2908_v9  ;;  %v1736_v9 = vunpack.c.h.bf16 %v2919_v49 }
 0x389   : > { %v1585_v13 = vpack.c.bf16 %v1577_v46, %v1577_v46  ;;  %v1578_v21 = vadd.f32 %v1570_v60, %v1554_v47 }
 0x38a   : > { %1596 = vst.msk [vmem:[%s2897_s24 + $0x10] sm:$0xf] %vm1593_vm15, %v1587_v63  ;;  %v1588_v15 = vpack.c.bf16 %v1580_v48, %v1580_v48  ;;  %v1735_v63 = vunpack.c.h.bf16 %v2911_v8 }
 0x38b   : > { %1594 = vst.msk [vmem:[%s2897_s24] sm:$0xf] %vm1593_vm15, %v1585_v13  ;;  %v1586_v0 = vpack.c.bf16 %v1578_v21, %v1578_v21 }
 0x38c   : > { %1597 = vst.msk [vmem:[%s2897_s24 + $0x18] sm:$0xf] %vm1593_vm15, %v1588_v15  ;;  %v1738_v15 = vunpack.c.h.bf16 %v2914_v30 }
 0x38d   : > { %1595 = vst.msk [vmem:[%s2897_s24 + $0x8] sm:$0xf] %vm1593_vm15, %v1586_v0 }
 0x391   : > { %v2001_v1 = vpop.f32.mrb[12].mxu0 }
 0x392   : > { %v1547_v10 = vadd.f32 %v2001_v1, %v2873_v4  ;;  %v1538_v56 = vpop.f32.mrb[13].mxu0 }
 0x393   : > { %v1539_v36 = vadd.f32 %v2873_v4, %v1538_v56  ;;  %v2002_v62 = vpop.f32.mrb[14].mxu0 }
 0x394   : > { %v1559_v57 = vmax.f32 %v1547_v10, 0.0  ;;  %v1550_v14 = vadd.f32 %v2002_v62, %v2873_v4  ;;  %v1541_v28 = vpop.f32.mrb[15].mxu0 }
 0x395   : > { %v1557_v33 = vmax.f32 %v1539_v36, 0.0  ;;  %v1542_v35 = vadd.f32 %v2873_v4, %v1541_v28 }
 0x396   : > { %v1583_v29 = vadd.f32 %v1575_v32, %v1559_v57  ;;  %v1560_v27 = vmax.f32 %v1550_v14, 0.0 }
 0x397   : > { %v1581_v45 = vadd.f32 %v1573_v3, %v1557_v33  ;;  %v1558_v6 = vmax.f32 %v1542_v35, 0.0 }
 0x398   : > { %v1591_v37 = vpack.c.bf16 %v1583_v29, %v1583_v29  ;;  %v1584_v17 = vadd.f32 %v1576_v20, %v1560_v27 }
 0x399   : > { %v1589_v34 = vpack.c.bf16 %v1581_v45, %v1581_v45  ;;  %v1582_v18 = vadd.f32 %v1574_v12, %v1558_v6 }
 0x39a   : > { %1600 = vst.msk [vmem:[%s2897_s24 + $0x30] sm:$0xf] %vm1593_vm15, %v1591_v37  ;;  %v1592_v40 = vpack.c.bf16 %v1584_v17, %v1584_v17 }
 0x39b   : > { %1598 = vst.msk [vmem:[%s2897_s24 + $0x20] sm:$0xf] %vm1593_vm15, %v1589_v34  ;;  %v1590_v41 = vpack.c.bf16 %v1582_v18, %v1582_v18 }
 0x39c   : > { %1601 = vst.msk [vmem:[%s2897_s24 + $0x38] sm:$0xf] %vm1593_vm15, %v1592_v40 }
 0x39d   : > { %1599 = vst.msk [vmem:[%s2897_s24 + $0x28] sm:$0xf] %vm1593_vm15, %v1590_v41 }
 0x3f4   : > { %v2009_v31 = vpop.f32.mrb[16].mxu0 }
 0x3f5   : > { %v1692_v52 = vadd.f32 %v2009_v31, %v2873_v4  ;;  %v1683_v42 = vpop.f32.mrb[17].mxu0 }
 0x3f6   : > { %v1684_v61 = vadd.f32 %v2873_v4, %v1683_v42  ;;  %v2010_v44 = vpop.f32.mrb[18].mxu0 }
 0x3f7   : > { %v1716_v38 = vmax.f32 %v1692_v52, 0.0  ;;  %v1695_v26 = vadd.f32 %v2010_v44, %v2873_v4  ;;  %v1686_v54 = vpop.f32.mrb[19].mxu0 }
 0x3f8   : > { %v1714_v55 = vmax.f32 %v1684_v61, 0.0  ;;  %v1687_v19 = vadd.f32 %v2873_v4, %v1686_v54 }
 0x3f9   : > { %v1741_v53 = vadd.f32 %v1733_v5, %v1716_v38  ;;  %v1717_v59 = vmax.f32 %v1695_v26, 0.0 }
 0x3fa   : > { %v1739_v2 = vadd.f32 %v1731_v43, %v1714_v55  ;;  %v1715_v50 = vmax.f32 %v1687_v19, 0.0 }
 0x3fb   : > { %v1749_v23 = vpack.c.bf16 %v1741_v53, %v1741_v53  ;;  %v1742_v7 = vadd.f32 %v1734_v22, %v1717_v59 }
 0x3fc   : > { %v1747_v16 = vpack.c.bf16 %v1739_v2, %v1739_v2  ;;  %v1740_v25 = vadd.f32 %v1732_v24, %v1715_v50 }
 0x3fd   : > { %1941 = vst.msk [vmem:[%s2897_s24 + $0x14] sm:$0xf] %vm1593_vm15, %v1749_v23  ;;  %v1750_v60 = vpack.c.bf16 %v1742_v7, %v1742_v7 }
 0x3fe   : > { %1939 = vst.msk [vmem:[%s2897_s24 + $0x4] sm:$0xf] %vm1593_vm15, %v1747_v16  ;;  %v1748_v11 = vpack.c.bf16 %v1740_v25, %v1740_v25 }
 0x3ff   : > { %1942 = vst.msk [vmem:[%s2897_s24 + $0x1c] sm:$0xf] %vm1593_vm15, %v1750_v60 }
 0x400   : > { %1940 = vst.msk [vmem:[%s2897_s24 + $0xc] sm:$0xf] %vm1593_vm15, %v1748_v11 }
 0x404   : > { %v2013_v51 = vpop.f32.mrb[20].mxu0 }
 0x405   : > { %v1708_v58 = vadd.f32 %v2013_v51, %v2873_v4  ;;  %v1699_v46 = vpop.f32.mrb[21].mxu0 }
 0x406   : > { %v1700_v47 = vadd.f32 %v2873_v4, %v1699_v46  ;;  %v2014_v48 = vpop.f32.mrb[22].mxu0 }
 0x407   : > { %v1720_v13 = vmax.f32 %v1708_v58, 0.0  ;;  %v1711_v21 = vadd.f32 %v2014_v48, %v2873_v4  ;;  %v1702_v0 = vpop.f32.mrb[23].mxu0 }
 0x408   : > { %v1718_v1 = vmax.f32 %v1700_v47, 0.0  ;;  %v1703_v10 = vadd.f32 %v2873_v4, %v1702_v0 }
 0x409   : > { %v1745_v32 = vadd.f32 %v1737_v39, %v1720_v13  ;;  %v1721_v56 = vmax.f32 %v1711_v21, 0.0 }
 0x40a   : > { %v1743_v8 = vadd.f32 %v1735_v63, %v1718_v1  ;;  %v1719_v36 = vmax.f32 %v1703_v10, 0.0 }
 0x40b   : > { %v1753_v3 = vpack.c.bf16 %v1745_v32, %v1745_v32  ;;  %v1746_v62 = vadd.f32 %v1738_v15, %v1721_v56 }
 0x40c   : > { %v1751_v30 = vpack.c.bf16 %v1743_v8, %v1743_v8  ;;  %v1744_v57 = vadd.f32 %v1736_v9, %v1719_v36 }
 0x40d   : > { %1945 = vst.msk [vmem:[%s2897_s24 + $0x34] sm:$0xf] %vm1593_vm15, %v1753_v3  ;;  %v1754_v14 = vpack.c.bf16 %v1746_v62, %v1746_v62 }
 0x40e   : > { %1943 = vst.msk [vmem:[%s2897_s24 + $0x24] sm:$0xf] %vm1593_vm15, %v1751_v30  ;;  %v1752_v4 = vpack.c.bf16 %v1744_v57, %v1744_v57 }
 0x40f   : > { %1946 = vst.msk [vmem:[%s2897_s24 + $0x3c] sm:$0xf] %vm1593_vm15, %v1754_v14 }
 0x410   : > { %1944 = vst.msk [vmem:[%s2897_s24 + $0x2c] sm:$0xf] %vm1593_vm15, %v1752_v4 }
 0x411   : > { %2137 = shalt.err (!%p2134_p3)
}
 0x412   : > { %s2138_s16 = scalar_lea.hbm %s2966_s15, 1024  ;;  %s2142_s26 = scalar_lea.hbm %s3027_s8, 4096 }
 0x413   : > { %p2139_p4 = scmp.ne.s32.totalorder %s2966_s15, %s2138_s16  ;;  %p2143_p2 = scmp.lt.u32.totalorder %s2966_s15, %s3027_s8 }
 0x414   : > { %p2144_p7 = scmp.lt.u32.totalorder %s2142_s26, %s2138_s16  ;;  %p2146_p6 = scmp.lt.u32.totalorder %s2138_s16, %s2966_s15 }
 0x415   : > { %p2140_p5 = pnand %p2139_p4, %p3040_p11 }
 0x416   : > { %p2145_p10 = por %p2144_p7, %p2143_p2 }
 0x417   : > { %p2141_p0 = pneg %p2140_p5 }
 0x418   : > { %p2147_p12 = por %p2146_p6, %p2145_p10 }
 0x41a   : > { %p2148_p8 = pnand %p2147_p12, %p2141_p0 }
 0x41c   : > { %2151 = shalt.err (!%p2148_p8)
}
 0x41d   : > { %s2205_s21 = smov 4  }
 0x41e   : > { %2017 = dma.vmem_to_hbm [thread:$0]  (%p3040_p11), %s2970_s10, 1024, %s2966_s15, %s1765_s9, %s2197_s12, %s2197_s12, %s2205_s21  }
 0x41f PF: > { %p2028_p9 = scmp.ge.s32.totalorder %s2190_s30, 2  ;;  %s1793_s13 = sand.u32 1, %s2178_s27  }
 0x420   : > { %p3041_p13 = scmp.ne.s32.totalorder %s3033_s18, 0  ;;  %s1794_s19 = scalar_lea.sflag [#allocation6], %s1793_s13 }
 0x422   : > { %p2024_p1 = pnand %p2028_p9, %p3041_p13 }
 0x424   : > { %2173 = dma.done.wait (!%p2024_p1), %s1794_s19, 1024  }
 0x425   : > { %2175 = vsyncadd (!%p2024_p1), %s1794_s19, 4294966272  ;;  %p21_p3 = scmp.ge.s32.totalorder %s2276_s11, 6   ;;  %s3042_s27 = smov %s2182_s28 }
 0x426   : > { %s3043_s28 = smov %s2186_s29  ;;  %s3044_s29 = smov %s2288_s14 }
 0x427   : > { %s3045_s30 = smov %s2276_s11  ;;  %23 = sbr.rel (!%p21_p3) target bundleno = 5 (0x5), region = 102 }
 0x42e   :  { %1799 = vsyncpa [#allocation5], 1 }
 0x42f   :  { %1801 = vsyncpa [#allocation5 + $0x1], 1 }
 0x430   :  { %1802 = vsyncpa [#allocation6], 1 }
 0x431   :  { %1804 = vsyncpa [#allocation6 + $0x1], 1 }

</bundles_post_ra>
